<compile_context>
chip_gen: v7x
topology: tpu7x:2x2x1
jax: 0.10.0
libtpu: 0.0.40
codegen_flags: <defaults>
</compile_context>

<pallas_src>
from functools import lru_cache

import numpy as np
import jax
import jax.numpy as jnp
from jax.experimental import pallas as pl
from jax.experimental.pallas import tpu as pltpu


# --------------------------------------------------------------------------- #
# Kernel
# --------------------------------------------------------------------------- #
def _make_sens_reduce_kernel(karatsuba: bool):
    """Build the kernel body.  Refs per grid step (batch dim squeezed):
         kr/ki      : (ct, H,  W )  k-space real/imag planes      (matmul dtype)
         sr/si      : (ct, Hp, Wp)  sens-map real/imag planes     (matmul dtype, DMA only)
         ahr/ahi[/ahs]: (Hp, H)     Re / Im [/ Re+Im] of A_H      (matmul dtype)
         awr/awi[/aws]: (W, Wp)     Re / Im [/ Re+Im] of A_W^T    (matmul dtype)
         out        : (2, Hp, Wp) f32 -- resident accumulator across the coil axis.
    """

    def kernel(*refs):
        if karatsuba:
            (kr_ref, ki_ref, sr_ref, si_ref,
             ahr_ref, ahi_ref, ahs_ref,
             awr_ref, awi_ref, aws_ref, out_ref) = refs
        else:
            (kr_ref, ki_ref, sr_ref, si_ref,
             ahr_ref, ahi_ref,
             awr_ref, awi_ref, out_ref) = refs
            ahs_ref = aws_ref = None

        f32 = jnp.float32
        ct = kr_ref.shape[0]
        mm = awr_ref.dtype                      # matmul input dtype (f32 or bf16)

        c_step = pl.program_id(1)

        @pl.when(c_step == 0)
        def _init():
            out_ref[...] = jnp.zeros_like(out_ref)

        ahr, ahi = ahr_ref[...], ahi_ref[...]
        awr, awi = awr_ref[...], awi_ref[...]
        if karatsuba:
            ahs, aws = ahs_ref[...], aws_ref[...]

        # Fully fused per-coil loop: intermediates stay at (H, W) / (Hp, Wp), and the
        # conj-combine accumulates straight into the resident output block.
        for c in range(ct):                     # ct is static (block shape)
            kr, ki = kr_ref[c], ki_ref[c]       # (H, W)

            # ---- Step 1: T = K @ A_W^T ----
            if karatsuba:
                t1 = jnp.dot(kr, awr, preferred_element_type=f32)
                t2 = jnp.dot(ki, awi, preferred_element_type=f32)
                # Karatsuba sum in f32, cast once (avoids hidden bf16 VPU converts on v5e).
                ks = (kr.astype(f32) + ki.astype(f32)).astype(mm)
                t3 = jnp.dot(ks, aws, preferred_element_type=f32)
                tr, ti = t1 - t2, t3 - t1 - t2
            else:
                tr = (jnp.dot(kr, awr, preferred_element_type=f32)
                      - jnp.dot(ki, awi, preferred_element_type=f32))
                ti = (jnp.dot(kr, awi, preferred_element_type=f32)
                      + jnp.dot(ki, awr, preferred_element_type=f32))

            # ---- Step 2: X = A_H @ T ----
            tr_m, ti_m = tr.astype(mm), ti.astype(mm)
            if karatsuba:
                u1 = jnp.dot(ahr, tr_m, preferred_element_type=f32)
                u2 = jnp.dot(ahi, ti_m, preferred_element_type=f32)
                u3 = jnp.dot(ahs, (tr + ti).astype(mm), preferred_element_type=f32)
                xr, xi = u1 - u2, u3 - u1 - u2
            else:
                xr = (jnp.dot(ahr, tr_m, preferred_element_type=f32)
                      - jnp.dot(ahi, ti_m, preferred_element_type=f32))
                xi = (jnp.dot(ahr, ti_m, preferred_element_type=f32)
                      + jnp.dot(ahi, tr_m, preferred_element_type=f32))

            # ---- x * conj(sens), accumulate into the resident output block ----
            sr = sr_ref[c].astype(f32)
            si = si_ref[c].astype(f32)
            out_ref[0] += xr * sr + xi * si
            out_ref[1] += xi * sr - xr * si

    return kernel


# --------------------------------------------------------------------------- #
# Host-side helpers
# --------------------------------------------------------------------------- #
@lru_cache(maxsize=None)
def _centered_idft_planes(n: int):
    """Real/imag f32 planes of M with M @ x == fftshift(ifft(ifftshift(x), norm='ortho'))."""
    eye = np.eye(n)
    m = np.fft.fftshift(
        np.fft.ifft(np.fft.ifftshift(eye, axes=0), axis=0, norm='ortho'),
        axes=0)
    return np.asarray(m.real, np.float32), np.asarray(m.imag, np.float32)


def _round_up(x: int, m: int) -> int:
    return ((x + m - 1) // m) * m


def _vmem_capacity_bytes() -> int:
    """Generation-aware VMEM capacity (128 MiB v5e/v6e, 64 MiB v7x), with fallback."""
    try:
        cap = int(getattr(pltpu.get_tpu_info(), "vmem_capacity_bytes"))
        if cap > 0:
            return cap
    except Exception:
        pass
    return 64 * 1024 * 1024          # conservative (v7x per-core VMEM)


def _footprint(H: int, W: int, Hp: int, Wp: int, mm_bytes: int, karatsuba: bool):
    """Per-step VMEM footprint model (bytes): (fixed, per_coil)."""
    f32b = 4
    # double-buffered per-step input blocks: 2 k-space planes + 2 sens planes per coil
    per_coil = 2 * 2 * (H * W + Hp * Wp) * mm_bytes
    nmat = 3 if karatsuba else 2
    fixed = (nmat * (Hp * H + W * Wp) * mm_bytes       # single-buffered constant matrices
             + 2 * 2 * Hp * Wp * f32b                  # double-buffered resident output
             + 10 * Hp * Wp * f32b)                    # in-flight per-coil f32 intermediates
    return fixed, per_coil


def _pick_coil_tile(C: int, fixed: int, per_coil: int, budget: int) -> int:
    avail = budget - fixed
    if avail < per_coil:
        return 1
    return int(max(1, min(C, avail // per_coil)))


def _const_spec(shape, index_map):
    """Single-buffered BlockSpec for grid-constant inputs (falls back if unsupported)."""
    try:
        return pl.BlockSpec(shape, index_map, pipeline_mode=pl.Buffered(1))
    except Exception:
        return pl.BlockSpec(shape, index_map)


# --------------------------------------------------------------------------- #
# Public wrapper
# --------------------------------------------------------------------------- #
def sens_reduce(kspace: jax.Array, sens_maps: jax.Array, *,
                coil_tile: int | None = None,
                matmul_dtype=jnp.float32,
                use_karatsuba: bool | None = None,
                lane_pad: bool | None = None) -> jax.Array:
    """kspace, sens_maps: [B, C, H, W, 2] float32 -> combined [B, 1, H, W, 2] float32.

    matmul_dtype : dtype of the MXU matmul inputs (f32 or bf16); accumulation and the
                   conj-combine always stay f32.
    use_karatsuba: None -> Karatsuba (6 matmuls) for f32, classical (8) for bf16
                   (pass True explicitly on MXU-bound v5e bf16).
    lane_pad     : None -> auto (pad W to a multiple of 128 only for W > 128, H to 8);
                   True forces padding; False disables it.
    """
    B, C, H, W, two = kspace.shape
    assert two == 2 and sens_maps.shape == kspace.shape

    mm = jnp.dtype(matmul_dtype)
    mm_bytes = mm.itemsize
    if use_karatsuba is None:
        # f32 matmuls are MXU-bound -> Karatsuba wins; bf16 on v6e/v7x is HBM/VPU-bound
        # -> classical form drops 2 constant matrices and the Karatsuba adds.
        use_karatsuba = (mm_bytes >= 4)

    # --- lane/sublane padding (production MRI widths like 368 -> 384) ---------------
    if lane_pad is None:
        Hp = _round_up(H, 8)
        Wp = _round_up(W, 128) if (W % 128 != 0 and W > 128) else W
    elif lane_pad:
        Hp, Wp = _round_up(H, 8), _round_up(W, 128)
    else:
        Hp, Wp = H, W

    # --- VMEM budget (generation-aware) and coil-tile selection ---------------------
    cap = _vmem_capacity_bytes()
    budget = int(0.45 * cap)
    fixed, per_coil = _footprint(H, W, Hp, Wp, mm_bytes, use_karatsuba)
    if coil_tile is None:
        ct = _pick_coil_tile(C, fixed, per_coil, budget)
    else:
        ct = max(1, min(C, int(coil_tile)))
    n_steps = -(-C // ct)                 # ceil: non-divisor tiles allowed (coil pad below)
    Cp = n_steps * ct
    est = fixed + ct * per_coil
    vmem_limit = int(min(max(int(1.3 * est), 32 * 1024 * 1024), int(0.9 * cap)))

    # --- split real/imag planes (matmul dtype DMA; sens upcast to f32 in-kernel) ----
    # NOTE: feeding a planar (B, C, 2, H, W) layout from upstream would remove these
    # slice/cast pre-passes entirely; kept here to honour the [B,C,H,W,2] contract.
    kr = kspace[..., 0].astype(mm)
    ki = kspace[..., 1].astype(mm)
    sr = sens_maps[..., 0].astype(mm)
    si = sens_maps[..., 1].astype(mm)

    if Cp > C:
        kr = jnp.pad(kr, ((0, 0), (0, Cp - C), (0, 0), (0, 0)))
        ki = jnp.pad(ki, ((0, 0), (0, Cp - C), (0, 0), (0, 0)))
    if Cp > C or Hp > H or Wp > W:
        pads = ((0, 0), (0, Cp - C), (0, Hp - H), (0, Wp - W))
        sr = jnp.pad(sr, pads)
        si = jnp.pad(si, pads)

    # --- centered IDFT matrices (cached), zero-padded to the lane-padded extents ----
    ah_r, ah_i = _centered_idft_planes(H)         # (H, H), applied on the left
    aw_r, aw_i = _centered_idft_planes(W)         # (W, W), applied as A_W^T on the right
    ahr_np = np.zeros((Hp, H), np.float32); ahr_np[:H, :] = ah_r
    ahi_np = np.zeros((Hp, H), np.float32); ahi_np[:H, :] = ah_i
    awr_np = np.zeros((W, Wp), np.float32); awr_np[:, :W] = aw_r.T
    awi_np = np.zeros((W, Wp), np.float32); awi_np[:, :W] = aw_i.T
    ahr, ahi = jnp.asarray(ahr_np, mm), jnp.asarray(ahi_np, mm)
    awr, awi = jnp.asarray(awr_np, mm), jnp.asarray(awi_np, mm)

    # --- BlockSpecs (batch squeezed; constants single-buffered; lane-dense output) --
    k_spec = pl.BlockSpec((None, ct, H, W), lambda b, c: (b, c, 0, 0))
    s_spec = pl.BlockSpec((None, ct, Hp, Wp), lambda b, c: (b, c, 0, 0))
    mat_h_spec = _const_spec((Hp, H), lambda b, c: (0, 0))
    mat_w_spec = _const_spec((W, Wp), lambda b, c: (0, 0))
    out_spec = pl.BlockSpec((None, 2, Hp, Wp), lambda b, c: (b, 0, 0, 0))

    in_specs = [k_spec, k_spec, s_spec, s_spec]
    operands = [kr, ki, sr, si]
    if use_karatsuba:
        ahs = jnp.asarray(ahr_np + ahi_np, mm)
        aws = jnp.asarray(awr_np + awi_np, mm)
        in_specs += [mat_h_spec, mat_h_spec, mat_h_spec,
                     mat_w_spec, mat_w_spec, mat_w_spec]
        operands += [ahr, ahi, ahs, awr, awi, aws]
    else:
        in_specs += [mat_h_spec, mat_h_spec, mat_w_spec, mat_w_spec]
        operands += [ahr, ahi, awr, awi]

    out = pl.pallas_call(
        _make_sens_reduce_kernel(use_karatsuba),
        out_shape=jax.ShapeDtypeStruct((B, 2, Hp, Wp), jnp.float32),
        grid_spec=pltpu.PrefetchScalarGridSpec(
            num_scalar_prefetch=0,
            grid=(B, n_steps),                  # coil reduction axis LAST
            in_specs=in_specs,
            out_specs=out_spec,
        ),
        compiler_params=pltpu.CompilerParams(
            dimension_semantics=("parallel", "arbitrary"),
            vmem_limit_bytes=vmem_limit),
    )(*operands)

    # Crop the lane padding and restack to the PyTorch convention [B, 1, H, W, 2].
    # (The restack is a full-output transpose; downstream consumers that accept the
    #  planar (B, 2, H, W) slab can take `out` directly and skip it.)
    out = out[:, :, :H, :W]
    return jnp.moveaxis(out, 1, -1)[:, None]


# --------------------------------------------------------------------------- #
# Pure-JAX reference (fastMRI-style ifft2c + conj-combine) and self-test
# --------------------------------------------------------------------------- #
def _reference_sens_reduce(kspace, sens_maps):
    kc = kspace[..., 0] + 1j * kspace[..., 1]
    x = jnp.fft.fftshift(
        jnp.fft.ifft2(jnp.fft.ifftshift(kc, axes=(-2, -1)),
                      axes=(-2, -1), norm='ortho'),
        axes=(-2, -1))
    sc = sens_maps[..., 0] - 1j * sens_maps[..., 1]
    comb = jnp.sum(x * sc, axis=1, keepdims=True)
    return jnp.stack([comb.real, comb.imag], axis=-1).astype(jnp.float32)


if __name__ == "__main__":
    B, C, H, W = 2, 5, 16, 16       # C=5 exercises the non-divisor coil-tile path
    key = jax.random.PRNGKey(0)
    k1, k2 = jax.random.split(key)
    kspace = jax.random.normal(k1, (B, C, H, W, 2), dtype=jnp.float32)
    sens_maps = jax.random.normal(k2, (B, C, H, W, 2), dtype=jnp.float32)

    ref = jax.block_until_ready(_reference_sens_reduce(kspace, sens_maps))

    # 1) Defaults: f32 matmuls, auto (generation-aware) coil tile, Karatsuba.
    out = jax.block_until_ready(sens_reduce(kspace, sens_maps))
    assert out.shape == (B, 1, H, W, 2), out.shape
    assert jnp.allclose(out, ref, atol=1e-4, rtol=1e-4), "default path mismatch"

    # 2) Classical 4-matmul form + non-divisor coil tile (C=5, ct=2 -> coil-padded to 6):
    #    exercises the per-coil fused accumulation across multiple grid steps.
    out2 = jax.block_until_ready(
        sens_reduce(kspace, sens_maps, coil_tile=2, use_karatsuba=False))
    assert jnp.allclose(out2, ref, atol=1e-4, rtol=1e-4), "classical/coil-pad mismatch"

    # 3) Lane-padded output path (W padded to 128 lanes, cropped after), one coil/step.
    out3 = jax.block_until_ready(
        sens_reduce(kspace, sens_maps, coil_tile=1, lane_pad=True))
    assert jnp.allclose(out3, ref, atol=1e-4, rtol=1e-4), "lane-pad mismatch"

    # 4) bf16 matmul inputs (k-space, sens DMA, IDFT matrices) with f32 accumulation:
    #    throughput path, checked with a loose normalized tolerance.
    out4 = jax.block_until_ready(
        sens_reduce(kspace, sens_maps, coil_tile=2, matmul_dtype=jnp.bfloat16))
    rel_err = float(jnp.max(jnp.abs(out4 - ref)) / jnp.max(jnp.abs(ref)))
    assert rel_err < 5e-2, f"bf16 path relative error too large: {rel_err}"

    print("KERNEL_OK")
</pallas_src>

<mosaic_0001>
module attributes {stable_mosaic.version = 11 : i64} {
  func.func @kernel(%arg0: i32, %arg1: i32, %arg2: memref<1x5x16x16xf32, #tpu.memory_space<vmem>>, %arg3: memref<1x5x16x16xf32, #tpu.memory_space<vmem>>, %arg4: memref<1x5x16x16xf32, #tpu.memory_space<vmem>>, %arg5: memref<1x5x16x16xf32, #tpu.memory_space<vmem>>, %arg6: memref<16x16xf32, #tpu.memory_space<vmem>>, %arg7: memref<16x16xf32, #tpu.memory_space<vmem>>, %arg8: memref<16x16xf32, #tpu.memory_space<vmem>>, %arg9: memref<16x16xf32, #tpu.memory_space<vmem>>, %arg10: memref<16x16xf32, #tpu.memory_space<vmem>>, %arg11: memref<16x16xf32, #tpu.memory_space<vmem>>, %arg12: memref<1x2x16x16xf32, #tpu.memory_space<vmem>>) attributes {dimension_semantics = [#tpu.dimension_semantics<parallel>, #tpu.dimension_semantics<arbitrary>], iteration_bounds = array<i64: 2, 1>, scalar_prefetch = 0 : i64, scratch_operands = 0 : i64, tpu.core_type = #tpu.core_type<tc>, window_params = [{transform_indices = @transform_0, window_bounds = array<i64: 1, 5, 16, 16>}, {transform_indices = @transform_1, window_bounds = array<i64: 1, 5, 16, 16>}, {transform_indices = @transform_2, window_bounds = array<i64: 1, 5, 16, 16>}, {transform_indices = @transform_3, window_bounds = array<i64: 1, 5, 16, 16>}, {pipeline_mode = #tpu.pipeline_mode<synchronous>, transform_indices = @transform_4, window_bounds = array<i64: 16, 16>}, {pipeline_mode = #tpu.pipeline_mode<synchronous>, transform_indices = @transform_5, window_bounds = array<i64: 16, 16>}, {pipeline_mode = #tpu.pipeline_mode<synchronous>, transform_indices = @transform_6, window_bounds = array<i64: 16, 16>}, {pipeline_mode = #tpu.pipeline_mode<synchronous>, transform_indices = @transform_7, window_bounds = array<i64: 16, 16>}, {pipeline_mode = #tpu.pipeline_mode<synchronous>, transform_indices = @transform_8, window_bounds = array<i64: 16, 16>}, {pipeline_mode = #tpu.pipeline_mode<synchronous>, transform_indices = @transform_9, window_bounds = array<i64: 16, 16>}, {transform_indices = @transform_10, window_bounds = array<i64: 1, 2, 16, 16>}]} {
    %c0_i32 = arith.constant 0 : i32
    %0 = arith.cmpi eq, %arg1, %c0_i32 : i32
    %1 = arith.extui %0 : i1 to i32
    %c0_i32_0 = arith.constant 0 : i32
    %2 = arith.cmpi ne, %1, %c0_i32_0 : i32
    scf.if %2 {
      %cst_197 = arith.constant 0.000000e+00 : f32
      %209 = vector.broadcast %cst_197 : f32 to vector<2x16x16xf32>
      %c0_198 = arith.constant 0 : index
      %c0_199 = arith.constant 0 : index
      %c0_200 = arith.constant 0 : index
      %c0_201 = arith.constant 0 : index
      %210 = vector.load %arg12[%c0_198, %c0_199, %c0_200, %c0_201] : memref<1x2x16x16xf32, #tpu.memory_space<vmem>>, vector<1x2x16x16xf32>
      %211 = vector.shape_cast %210 : vector<1x2x16x16xf32> to vector<2x16x16xf32>
      %212 = vector.shape_cast %209 : vector<2x16x16xf32> to vector<1x2x16x16xf32>
      tpu.vector_store %arg12[%c0_198, %c0_199, %c0_200, %c0_201], %212 {strides = array<i32>} : memref<1x2x16x16xf32, #tpu.memory_space<vmem>>, vector<1x2x16x16xf32>,
    } else {
    }
    %c0 = arith.constant 0 : index
    %c0_1 = arith.constant 0 : index
    %3 = vector.load %arg6[%c0, %c0_1] : memref<16x16xf32, #tpu.memory_space<vmem>>, vector<16x16xf32>
    %c0_2 = arith.constant 0 : index
    %c0_3 = arith.constant 0 : index
    %4 = vector.load %arg7[%c0_2, %c0_3] : memref<16x16xf32, #tpu.memory_space<vmem>>, vector<16x16xf32>
    %c0_4 = arith.constant 0 : index
    %c0_5 = arith.constant 0 : index
    %5 = vector.load %arg9[%c0_4, %c0_5] : memref<16x16xf32, #tpu.memory_space<vmem>>, vector<16x16xf32>
    %c0_6 = arith.constant 0 : index
    %c0_7 = arith.constant 0 : index
    %6 = vector.load %arg10[%c0_6, %c0_7] : memref<16x16xf32, #tpu.memory_space<vmem>>, vector<16x16xf32>
    %c0_8 = arith.constant 0 : index
    %c0_9 = arith.constant 0 : index
    %7 = vector.load %arg8[%c0_8, %c0_9] : memref<16x16xf32, #tpu.memory_space<vmem>>, vector<16x16xf32>
    %c0_10 = arith.constant 0 : index
    %c0_11 = arith.constant 0 : index
    %8 = vector.load %arg11[%c0_10, %c0_11] : memref<16x16xf32, #tpu.memory_space<vmem>>, vector<16x16xf32>
    %c0_12 = arith.constant 0 : index
    %c0_13 = arith.constant 0 : index
    %c0_14 = arith.constant 0 : index
    %c0_15 = arith.constant 0 : index
    %9 = vector.load %arg2[%c0_12, %c0_13, %c0_14, %c0_15] : memref<1x5x16x16xf32, #tpu.memory_space<vmem>>, vector<1x1x16x16xf32>
    %10 = vector.shape_cast %9 : vector<1x1x16x16xf32> to vector<16x16xf32>
    %c0_16 = arith.constant 0 : index
    %c0_17 = arith.constant 0 : index
    %c0_18 = arith.constant 0 : index
    %c0_19 = arith.constant 0 : index
    %11 = vector.load %arg3[%c0_16, %c0_17, %c0_18, %c0_19] : memref<1x5x16x16xf32, #tpu.memory_space<vmem>>, vector<1x1x16x16xf32>
    %12 = vector.shape_cast %11 : vector<1x1x16x16xf32> to vector<16x16xf32>
    %cst = arith.constant dense<0.000000e+00> : vector<16x16xf32>
    %13 = tpu.matmul %10, %5, %cst {dimension_numbers = #tpu.dot_dimension_numbers<[1], [0], [0], [1], [0, 0, 1, 1], [], []>} : vector<16x16xf32>, vector<16x16xf32>, vector<16x16xf32> -> vector<16x16xf32>
    %cst_20 = arith.constant dense<0.000000e+00> : vector<16x16xf32>
    %14 = tpu.matmul %12, %6, %cst_20 {dimension_numbers = #tpu.dot_dimension_numbers<[1], [0], [0], [1], [0, 0, 1, 1], [], []>} : vector<16x16xf32>, vector<16x16xf32>, vector<16x16xf32> -> vector<16x16xf32>
    %15 = arith.addf %10, %12 : vector<16x16xf32>
    %cst_21 = arith.constant dense<0.000000e+00> : vector<16x16xf32>
    %16 = tpu.matmul %15, %8, %cst_21 {dimension_numbers = #tpu.dot_dimension_numbers<[1], [0], [0], [1], [0, 0, 1, 1], [], []>} : vector<16x16xf32>, vector<16x16xf32>, vector<16x16xf32> -> vector<16x16xf32>
    %17 = arith.subf %13, %14 : vector<16x16xf32>
    %18 = arith.subf %16, %13 : vector<16x16xf32>
    %19 = arith.subf %18, %14 : vector<16x16xf32>
    %cst_22 = arith.constant dense<0.000000e+00> : vector<16x16xf32>
    %20 = tpu.matmul %3, %17, %cst_22 {dimension_numbers = #tpu.dot_dimension_numbers<[1], [0], [0], [1], [0, 0, 1, 1], [], []>} : vector<16x16xf32>, vector<16x16xf32>, vector<16x16xf32> -> vector<16x16xf32>
    %cst_23 = arith.constant dense<0.000000e+00> : vector<16x16xf32>
    %21 = tpu.matmul %4, %19, %cst_23 {dimension_numbers = #tpu.dot_dimension_numbers<[1], [0], [0], [1], [0, 0, 1, 1], [], []>} : vector<16x16xf32>, vector<16x16xf32>, vector<16x16xf32> -> vector<16x16xf32>
    %22 = arith.addf %17, %19 : vector<16x16xf32>
    %cst_24 = arith.constant dense<0.000000e+00> : vector<16x16xf32>
    %23 = tpu.matmul %7, %22, %cst_24 {dimension_numbers = #tpu.dot_dimension_numbers<[1], [0], [0], [1], [0, 0, 1, 1], [], []>} : vector<16x16xf32>, vector<16x16xf32>, vector<16x16xf32> -> vector<16x16xf32>
    %24 = arith.subf %20, %21 : vector<16x16xf32>
    %25 = arith.subf %23, %20 : vector<16x16xf32>
    %26 = arith.subf %25, %21 : vector<16x16xf32>
    %c0_25 = arith.constant 0 : index
    %c0_26 = arith.constant 0 : index
    %c0_27 = arith.constant 0 : index
    %c0_28 = arith.constant 0 : index
    %27 = vector.load %arg4[%c0_25, %c0_26, %c0_27, %c0_28] : memref<1x5x16x16xf32, #tpu.memory_space<vmem>>, vector<1x1x16x16xf32>
    %28 = vector.shape_cast %27 : vector<1x1x16x16xf32> to vector<16x16xf32>
    %c0_29 = arith.constant 0 : index
    %c0_30 = arith.constant 0 : index
    %c0_31 = arith.constant 0 : index
    %c0_32 = arith.constant 0 : index
    %29 = vector.load %arg5[%c0_29, %c0_30, %c0_31, %c0_32] : memref<1x5x16x16xf32, #tpu.memory_space<vmem>>, vector<1x1x16x16xf32>
    %30 = vector.shape_cast %29 : vector<1x1x16x16xf32> to vector<16x16xf32>
    %c0_33 = arith.constant 0 : index
    %c0_34 = arith.constant 0 : index
    %c0_35 = arith.constant 0 : index
    %c0_36 = arith.constant 0 : index
    %31 = vector.load %arg12[%c0_33, %c0_34, %c0_35, %c0_36] : memref<1x2x16x16xf32, #tpu.memory_space<vmem>>, vector<1x1x16x16xf32>
    %32 = vector.shape_cast %31 : vector<1x1x16x16xf32> to vector<16x16xf32>
    %33 = arith.mulf %24, %28 : vector<16x16xf32>
    %34 = arith.mulf %26, %30 : vector<16x16xf32>
    %35 = arith.addf %33, %34 : vector<16x16xf32>
    %36 = arith.addf %32, %35 : vector<16x16xf32>
    %c0_37 = arith.constant 0 : index
    %c0_38 = arith.constant 0 : index
    %c0_39 = arith.constant 0 : index
    %c0_40 = arith.constant 0 : index
    %37 = vector.load %arg12[%c0_37, %c0_38, %c0_39, %c0_40] : memref<1x2x16x16xf32, #tpu.memory_space<vmem>>, vector<1x1x16x16xf32>
    %38 = vector.shape_cast %37 : vector<1x1x16x16xf32> to vector<16x16xf32>
    %39 = vector.shape_cast %36 : vector<16x16xf32> to vector<1x1x16x16xf32>
    tpu.vector_store %arg12[%c0_37, %c0_38, %c0_39, %c0_40], %39 {strides = array<i32>} : memref<1x2x16x16xf32, #tpu.memory_space<vmem>>, vector<1x1x16x16xf32>,
    %c0_41 = arith.constant 0 : index
    %c1 = arith.constant 1 : index
    %c0_42 = arith.constant 0 : index
    %c0_43 = arith.constant 0 : index
    %40 = vector.load %arg12[%c0_41, %c1, %c0_42, %c0_43] : memref<1x2x16x16xf32, #tpu.memory_space<vmem>>, vector<1x1x16x16xf32>
    %41 = vector.shape_cast %40 : vector<1x1x16x16xf32> to vector<16x16xf32>
    %42 = arith.mulf %26, %28 : vector<16x16xf32>
    %43 = arith.mulf %24, %30 : vector<16x16xf32>
    %44 = arith.subf %42, %43 : vector<16x16xf32>
    %45 = arith.addf %41, %44 : vector<16x16xf32>
    %c0_44 = arith.constant 0 : index
    %c1_45 = arith.constant 1 : index
    %c0_46 = arith.constant 0 : index
    %c0_47 = arith.constant 0 : index
    %46 = vector.load %arg12[%c0_44, %c1_45, %c0_46, %c0_47] : memref<1x2x16x16xf32, #tpu.memory_space<vmem>>, vector<1x1x16x16xf32>
    %47 = vector.shape_cast %46 : vector<1x1x16x16xf32> to vector<16x16xf32>
    %48 = vector.shape_cast %45 : vector<16x16xf32> to vector<1x1x16x16xf32>
    tpu.vector_store %arg12[%c0_44, %c1_45, %c0_46, %c0_47], %48 {strides = array<i32>} : memref<1x2x16x16xf32, #tpu.memory_space<vmem>>, vector<1x1x16x16xf32>,
    %c0_48 = arith.constant 0 : index
    %c1_49 = arith.constant 1 : index
    %c0_50 = arith.constant 0 : index
    %c0_51 = arith.constant 0 : index
    %49 = vector.load %arg2[%c0_48, %c1_49, %c0_50, %c0_51] : memref<1x5x16x16xf32, #tpu.memory_space<vmem>>, vector<1x1x16x16xf32>
    %50 = vector.shape_cast %49 : vector<1x1x16x16xf32> to vector<16x16xf32>
    %c0_52 = arith.constant 0 : index
    %c1_53 = arith.constant 1 : index
    %c0_54 = arith.constant 0 : index
    %c0_55 = arith.constant 0 : index
    %51 = vector.load %arg3[%c0_52, %c1_53, %c0_54, %c0_55] : memref<1x5x16x16xf32, #tpu.memory_space<vmem>>, vector<1x1x16x16xf32>
    %52 = vector.shape_cast %51 : vector<1x1x16x16xf32> to vector<16x16xf32>
    %cst_56 = arith.constant dense<0.000000e+00> : vector<16x16xf32>
    %53 = tpu.matmul %50, %5, %cst_56 {dimension_numbers = #tpu.dot_dimension_numbers<[1], [0], [0], [1], [0, 0, 1, 1], [], []>} : vector<16x16xf32>, vector<16x16xf32>, vector<16x16xf32> -> vector<16x16xf32>
    %cst_57 = arith.constant dense<0.000000e+00> : vector<16x16xf32>
    %54 = tpu.matmul %52, %6, %cst_57 {dimension_numbers = #tpu.dot_dimension_numbers<[1], [0], [0], [1], [0, 0, 1, 1], [], []>} : vector<16x16xf32>, vector<16x16xf32>, vector<16x16xf32> -> vector<16x16xf32>
    %55 = arith.addf %50, %52 : vector<16x16xf32>
    %cst_58 = arith.constant dense<0.000000e+00> : vector<16x16xf32>
    %56 = tpu.matmul %55, %8, %cst_58 {dimension_numbers = #tpu.dot_dimension_numbers<[1], [0], [0], [1], [0, 0, 1, 1], [], []>} : vector<16x16xf32>, vector<16x16xf32>, vector<16x16xf32> -> vector<16x16xf32>
    %57 = arith.subf %53, %54 : vector<16x16xf32>
    %58 = arith.subf %56, %53 : vector<16x16xf32>
    %59 = arith.subf %58, %54 : vector<16x16xf32>
    %cst_59 = arith.constant dense<0.000000e+00> : vector<16x16xf32>
    %60 = tpu.matmul %3, %57, %cst_59 {dimension_numbers = #tpu.dot_dimension_numbers<[1], [0], [0], [1], [0, 0, 1, 1], [], []>} : vector<16x16xf32>, vector<16x16xf32>, vector<16x16xf32> -> vector<16x16xf32>
    %cst_60 = arith.constant dense<0.000000e+00> : vector<16x16xf32>
    %61 = tpu.matmul %4, %59, %cst_60 {dimension_numbers = #tpu.dot_dimension_numbers<[1], [0], [0], [1], [0, 0, 1, 1], [], []>} : vector<16x16xf32>, vector<16x16xf32>, vector<16x16xf32> -> vector<16x16xf32>
    %62 = arith.addf %57, %59 : vector<16x16xf32>
    %cst_61 = arith.constant dense<0.000000e+00> : vector<16x16xf32>
    %63 = tpu.matmul %7, %62, %cst_61 {dimension_numbers = #tpu.dot_dimension_numbers<[1], [0], [0], [1], [0, 0, 1, 1], [], []>} : vector<16x16xf32>, vector<16x16xf32>, vector<16x16xf32> -> vector<16x16xf32>
    %64 = arith.subf %60, %61 : vector<16x16xf32>
    %65 = arith.subf %63, %60 : vector<16x16xf32>
    %66 = arith.subf %65, %61 : vector<16x16xf32>
    %c0_62 = arith.constant 0 : index
    %c1_63 = arith.constant 1 : index
    %c0_64 = arith.constant 0 : index
    %c0_65 = arith.constant 0 : index
    %67 = vector.load %arg4[%c0_62, %c1_63, %c0_64, %c0_65] : memref<1x5x16x16xf32, #tpu.memory_space<vmem>>, vector<1x1x16x16xf32>
    %68 = vector.shape_cast %67 : vector<1x1x16x16xf32> to vector<16x16xf32>
    %c0_66 = arith.constant 0 : index
    %c1_67 = arith.constant 1 : index
    %c0_68 = arith.constant 0 : index
    %c0_69 = arith.constant 0 : index
    %69 = vector.load %arg5[%c0_66, %c1_67, %c0_68, %c0_69] : memref<1x5x16x16xf32, #tpu.memory_space<vmem>>, vector<1x1x16x16xf32>
    %70 = vector.shape_cast %69 : vector<1x1x16x16xf32> to vector<16x16xf32>
    %c0_70 = arith.constant 0 : index
    %c0_71 = arith.constant 0 : index
    %c0_72 = arith.constant 0 : index
    %c0_73 = arith.constant 0 : index
    %71 = vector.load %arg12[%c0_70, %c0_71, %c0_72, %c0_73] : memref<1x2x16x16xf32, #tpu.memory_space<vmem>>, vector<1x1x16x16xf32>
    %72 = vector.shape_cast %71 : vector<1x1x16x16xf32> to vector<16x16xf32>
    %73 = arith.mulf %64, %68 : vector<16x16xf32>
    %74 = arith.mulf %66, %70 : vector<16x16xf32>
    %75 = arith.addf %73, %74 : vector<16x16xf32>
    %76 = arith.addf %72, %75 : vector<16x16xf32>
    %c0_74 = arith.constant 0 : index
    %c0_75 = arith.constant 0 : index
    %c0_76 = arith.constant 0 : index
    %c0_77 = arith.constant 0 : index
    %77 = vector.load %arg12[%c0_74, %c0_75, %c0_76, %c0_77] : memref<1x2x16x16xf32, #tpu.memory_space<vmem>>, vector<1x1x16x16xf32>
    %78 = vector.shape_cast %77 : vector<1x1x16x16xf32> to vector<16x16xf32>
    %79 = vector.shape_cast %76 : vector<16x16xf32> to vector<1x1x16x16xf32>
    tpu.vector_store %arg12[%c0_74, %c0_75, %c0_76, %c0_77], %79 {strides = array<i32>} : memref<1x2x16x16xf32, #tpu.memory_space<vmem>>, vector<1x1x16x16xf32>,
    %c0_78 = arith.constant 0 : index
    %c1_79 = arith.constant 1 : index
    %c0_80 = arith.constant 0 : index
    %c0_81 = arith.constant 0 : index
    %80 = vector.load %arg12[%c0_78, %c1_79, %c0_80, %c0_81] : memref<1x2x16x16xf32, #tpu.memory_space<vmem>>, vector<1x1x16x16xf32>
    %81 = vector.shape_cast %80 : vector<1x1x16x16xf32> to vector<16x16xf32>
    %82 = arith.mulf %66, %68 : vector<16x16xf32>
    %83 = arith.mulf %64, %70 : vector<16x16xf32>
    %84 = arith.subf %82, %83 : vector<16x16xf32>
    %85 = arith.addf %81, %84 : vector<16x16xf32>
    %c0_82 = arith.constant 0 : index
    %c1_83 = arith.constant 1 : index
    %c0_84 = arith.constant 0 : index
    %c0_85 = arith.constant 0 : index
    %86 = vector.load %arg12[%c0_82, %c1_83, %c0_84, %c0_85] : memref<1x2x16x16xf32, #tpu.memory_space<vmem>>, vector<1x1x16x16xf32>
    %87 = vector.shape_cast %86 : vector<1x1x16x16xf32> to vector<16x16xf32>
    %88 = vector.shape_cast %85 : vector<16x16xf32> to vector<1x1x16x16xf32>
    tpu.vector_store %arg12[%c0_82, %c1_83, %c0_84, %c0_85], %88 {strides = array<i32>} : memref<1x2x16x16xf32, #tpu.memory_space<vmem>>, vector<1x1x16x16xf32>,
    %c0_86 = arith.constant 0 : index
    %c2 = arith.constant 2 : index
    %c0_87 = arith.constant 0 : index
    %c0_88 = arith.constant 0 : index
    %89 = vector.load %arg2[%c0_86, %c2, %c0_87, %c0_88] : memref<1x5x16x16xf32, #tpu.memory_space<vmem>>, vector<1x1x16x16xf32>
    %90 = vector.shape_cast %89 : vector<1x1x16x16xf32> to vector<16x16xf32>
    %c0_89 = arith.constant 0 : index
    %c2_90 = arith.constant 2 : index
    %c0_91 = arith.constant 0 : index
    %c0_92 = arith.constant 0 : index
    %91 = vector.load %arg3[%c0_89, %c2_90, %c0_91, %c0_92] : memref<1x5x16x16xf32, #tpu.memory_space<vmem>>, vector<1x1x16x16xf32>
    %92 = vector.shape_cast %91 : vector<1x1x16x16xf32> to vector<16x16xf32>
    %cst_93 = arith.constant dense<0.000000e+00> : vector<16x16xf32>
    %93 = tpu.matmul %90, %5, %cst_93 {dimension_numbers = #tpu.dot_dimension_numbers<[1], [0], [0], [1], [0, 0, 1, 1], [], []>} : vector<16x16xf32>, vector<16x16xf32>, vector<16x16xf32> -> vector<16x16xf32>
    %cst_94 = arith.constant dense<0.000000e+00> : vector<16x16xf32>
    %94 = tpu.matmul %92, %6, %cst_94 {dimension_numbers = #tpu.dot_dimension_numbers<[1], [0], [0], [1], [0, 0, 1, 1], [], []>} : vector<16x16xf32>, vector<16x16xf32>, vector<16x16xf32> -> vector<16x16xf32>
    %95 = arith.addf %90, %92 : vector<16x16xf32>
    %cst_95 = arith.constant dense<0.000000e+00> : vector<16x16xf32>
    %96 = tpu.matmul %95, %8, %cst_95 {dimension_numbers = #tpu.dot_dimension_numbers<[1], [0], [0], [1], [0, 0, 1, 1], [], []>} : vector<16x16xf32>, vector<16x16xf32>, vector<16x16xf32> -> vector<16x16xf32>
    %97 = arith.subf %93, %94 : vector<16x16xf32>
    %98 = arith.subf %96, %93 : vector<16x16xf32>
    %99 = arith.subf %98, %94 : vector<16x16xf32>
    %cst_96 = arith.constant dense<0.000000e+00> : vector<16x16xf32>
    %100 = tpu.matmul %3, %97, %cst_96 {dimension_numbers = #tpu.dot_dimension_numbers<[1], [0], [0], [1], [0, 0, 1, 1], [], []>} : vector<16x16xf32>, vector<16x16xf32>, vector<16x16xf32> -> vector<16x16xf32>
    %cst_97 = arith.constant dense<0.000000e+00> : vector<16x16xf32>
    %101 = tpu.matmul %4, %99, %cst_97 {dimension_numbers = #tpu.dot_dimension_numbers<[1], [0], [0], [1], [0, 0, 1, 1], [], []>} : vector<16x16xf32>, vector<16x16xf32>, vector<16x16xf32> -> vector<16x16xf32>
    %102 = arith.addf %97, %99 : vector<16x16xf32>
    %cst_98 = arith.constant dense<0.000000e+00> : vector<16x16xf32>
    %103 = tpu.matmul %7, %102, %cst_98 {dimension_numbers = #tpu.dot_dimension_numbers<[1], [0], [0], [1], [0, 0, 1, 1], [], []>} : vector<16x16xf32>, vector<16x16xf32>, vector<16x16xf32> -> vector<16x16xf32>
    %104 = arith.subf %100, %101 : vector<16x16xf32>
    %105 = arith.subf %103, %100 : vector<16x16xf32>
    %106 = arith.subf %105, %101 : vector<16x16xf32>
    %c0_99 = arith.constant 0 : index
    %c2_100 = arith.constant 2 : index
    %c0_101 = arith.constant 0 : index
    %c0_102 = arith.constant 0 : index
    %107 = vector.load %arg4[%c0_99, %c2_100, %c0_101, %c0_102] : memref<1x5x16x16xf32, #tpu.memory_space<vmem>>, vector<1x1x16x16xf32>
    %108 = vector.shape_cast %107 : vector<1x1x16x16xf32> to vector<16x16xf32>
    %c0_103 = arith.constant 0 : index
    %c2_104 = arith.constant 2 : index
    %c0_105 = arith.constant 0 : index
    %c0_106 = arith.constant 0 : index
    %109 = vector.load %arg5[%c0_103, %c2_104, %c0_105, %c0_106] : memref<1x5x16x16xf32, #tpu.memory_space<vmem>>, vector<1x1x16x16xf32>
    %110 = vector.shape_cast %109 : vector<1x1x16x16xf32> to vector<16x16xf32>
    %c0_107 = arith.constant 0 : index
    %c0_108 = arith.constant 0 : index
    %c0_109 = arith.constant 0 : index
    %c0_110 = arith.constant 0 : index
    %111 = vector.load %arg12[%c0_107, %c0_108, %c0_109, %c0_110] : memref<1x2x16x16xf32, #tpu.memory_space<vmem>>, vector<1x1x16x16xf32>
    %112 = vector.shape_cast %111 : vector<1x1x16x16xf32> to vector<16x16xf32>
    %113 = arith.mulf %104, %108 : vector<16x16xf32>
    %114 = arith.mulf %106, %110 : vector<16x16xf32>
    %115 = arith.addf %113, %114 : vector<16x16xf32>
    %116 = arith.addf %112, %115 : vector<16x16xf32>
    %c0_111 = arith.constant 0 : index
    %c0_112 = arith.constant 0 : index
    %c0_113 = arith.constant 0 : index
    %c0_114 = arith.constant 0 : index
    %117 = vector.load %arg12[%c0_111, %c0_112, %c0_113, %c0_114] : memref<1x2x16x16xf32, #tpu.memory_space<vmem>>, vector<1x1x16x16xf32>
    %118 = vector.shape_cast %117 : vector<1x1x16x16xf32> to vector<16x16xf32>
    %119 = vector.shape_cast %116 : vector<16x16xf32> to vector<1x1x16x16xf32>
    tpu.vector_store %arg12[%c0_111, %c0_112, %c0_113, %c0_114], %119 {strides = array<i32>} : memref<1x2x16x16xf32, #tpu.memory_space<vmem>>, vector<1x1x16x16xf32>,
    %c0_115 = arith.constant 0 : index
    %c1_116 = arith.constant 1 : index
    %c0_117 = arith.constant 0 : index
    %c0_118 = arith.constant 0 : index
    %120 = vector.load %arg12[%c0_115, %c1_116, %c0_117, %c0_118] : memref<1x2x16x16xf32, #tpu.memory_space<vmem>>, vector<1x1x16x16xf32>
    %121 = vector.shape_cast %120 : vector<1x1x16x16xf32> to vector<16x16xf32>
    %122 = arith.mulf %106, %108 : vector<16x16xf32>
    %123 = arith.mulf %104, %110 : vector<16x16xf32>
    %124 = arith.subf %122, %123 : vector<16x16xf32>
    %125 = arith.addf %121, %124 : vector<16x16xf32>
    %c0_119 = arith.constant 0 : index
    %c1_120 = arith.constant 1 : index
    %c0_121 = arith.constant 0 : index
    %c0_122 = arith.constant 0 : index
    %126 = vector.load %arg12[%c0_119, %c1_120, %c0_121, %c0_122] : memref<1x2x16x16xf32, #tpu.memory_space<vmem>>, vector<1x1x16x16xf32>
    %127 = vector.shape_cast %126 : vector<1x1x16x16xf32> to vector<16x16xf32>
    %128 = vector.shape_cast %125 : vector<16x16xf32> to vector<1x1x16x16xf32>
    tpu.vector_store %arg12[%c0_119, %c1_120, %c0_121, %c0_122], %128 {strides = array<i32>} : memref<1x2x16x16xf32, #tpu.memory_space<vmem>>, vector<1x1x16x16xf32>,
    %c0_123 = arith.constant 0 : index
    %c3 = arith.constant 3 : index
    %c0_124 = arith.constant 0 : index
    %c0_125 = arith.constant 0 : index
    %129 = vector.load %arg2[%c0_123, %c3, %c0_124, %c0_125] : memref<1x5x16x16xf32, #tpu.memory_space<vmem>>, vector<1x1x16x16xf32>
    %130 = vector.shape_cast %129 : vector<1x1x16x16xf32> to vector<16x16xf32>
    %c0_126 = arith.constant 0 : index
    %c3_127 = arith.constant 3 : index
    %c0_128 = arith.constant 0 : index
    %c0_129 = arith.constant 0 : index
    %131 = vector.load %arg3[%c0_126, %c3_127, %c0_128, %c0_129] : memref<1x5x16x16xf32, #tpu.memory_space<vmem>>, vector<1x1x16x16xf32>
    %132 = vector.shape_cast %131 : vector<1x1x16x16xf32> to vector<16x16xf32>
    %cst_130 = arith.constant dense<0.000000e+00> : vector<16x16xf32>
    %133 = tpu.matmul %130, %5, %cst_130 {dimension_numbers = #tpu.dot_dimension_numbers<[1], [0], [0], [1], [0, 0, 1, 1], [], []>} : vector<16x16xf32>, vector<16x16xf32>, vector<16x16xf32> -> vector<16x16xf32>
    %cst_131 = arith.constant dense<0.000000e+00> : vector<16x16xf32>
    %134 = tpu.matmul %132, %6, %cst_131 {dimension_numbers = #tpu.dot_dimension_numbers<[1], [0], [0], [1], [0, 0, 1, 1], [], []>} : vector<16x16xf32>, vector<16x16xf32>, vector<16x16xf32> -> vector<16x16xf32>
    %135 = arith.addf %130, %132 : vector<16x16xf32>
    %cst_132 = arith.constant dense<0.000000e+00> : vector<16x16xf32>
    %136 = tpu.matmul %135, %8, %cst_132 {dimension_numbers = #tpu.dot_dimension_numbers<[1], [0], [0], [1], [0, 0, 1, 1], [], []>} : vector<16x16xf32>, vector<16x16xf32>, vector<16x16xf32> -> vector<16x16xf32>
    %137 = arith.subf %133, %134 : vector<16x16xf32>
    %138 = arith.subf %136, %133 : vector<16x16xf32>
    %139 = arith.subf %138, %134 : vector<16x16xf32>
    %cst_133 = arith.constant dense<0.000000e+00> : vector<16x16xf32>
    %140 = tpu.matmul %3, %137, %cst_133 {dimension_numbers = #tpu.dot_dimension_numbers<[1], [0], [0], [1], [0, 0, 1, 1], [], []>} : vector<16x16xf32>, vector<16x16xf32>, vector<16x16xf32> -> vector<16x16xf32>
    %cst_134 = arith.constant dense<0.000000e+00> : vector<16x16xf32>
    %141 = tpu.matmul %4, %139, %cst_134 {dimension_numbers = #tpu.dot_dimension_numbers<[1], [0], [0], [1], [0, 0, 1, 1], [], []>} : vector<16x16xf32>, vector<16x16xf32>, vector<16x16xf32> -> vector<16x16xf32>
    %142 = arith.addf %137, %139 : vector<16x16xf32>
    %cst_135 = arith.constant dense<0.000000e+00> : vector<16x16xf32>
    %143 = tpu.matmul %7, %142, %cst_135 {dimension_numbers = #tpu.dot_dimension_numbers<[1], [0], [0], [1], [0, 0, 1, 1], [], []>} : vector<16x16xf32>, vector<16x16xf32>, vector<16x16xf32> -> vector<16x16xf32>
    %144 = arith.subf %140, %141 : vector<16x16xf32>
    %145 = arith.subf %143, %140 : vector<16x16xf32>
    %146 = arith.subf %145, %141 : vector<16x16xf32>
    %c0_136 = arith.constant 0 : index
    %c3_137 = arith.constant 3 : index
    %c0_138 = arith.constant 0 : index
    %c0_139 = arith.constant 0 : index
    %147 = vector.load %arg4[%c0_136, %c3_137, %c0_138, %c0_139] : memref<1x5x16x16xf32, #tpu.memory_space<vmem>>, vector<1x1x16x16xf32>
    %148 = vector.shape_cast %147 : vector<1x1x16x16xf32> to vector<16x16xf32>
    %c0_140 = arith.constant 0 : index
    %c3_141 = arith.constant 3 : index
    %c0_142 = arith.constant 0 : index
    %c0_143 = arith.constant 0 : index
    %149 = vector.load %arg5[%c0_140, %c3_141, %c0_142, %c0_143] : memref<1x5x16x16xf32, #tpu.memory_space<vmem>>, vector<1x1x16x16xf32>
    %150 = vector.shape_cast %149 : vector<1x1x16x16xf32> to vector<16x16xf32>
    %c0_144 = arith.constant 0 : index
    %c0_145 = arith.constant 0 : index
    %c0_146 = arith.constant 0 : index
    %c0_147 = arith.constant 0 : index
    %151 = vector.load %arg12[%c0_144, %c0_145, %c0_146, %c0_147] : memref<1x2x16x16xf32, #tpu.memory_space<vmem>>, vector<1x1x16x16xf32>
    %152 = vector.shape_cast %151 : vector<1x1x16x16xf32> to vector<16x16xf32>
    %153 = arith.mulf %144, %148 : vector<16x16xf32>
    %154 = arith.mulf %146, %150 : vector<16x16xf32>
    %155 = arith.addf %153, %154 : vector<16x16xf32>
    %156 = arith.addf %152, %155 : vector<16x16xf32>
    %c0_148 = arith.constant 0 : index
    %c0_149 = arith.constant 0 : index
    %c0_150 = arith.constant 0 : index
    %c0_151 = arith.constant 0 : index
    %157 = vector.load %arg12[%c0_148, %c0_149, %c0_150, %c0_151] : memref<1x2x16x16xf32, #tpu.memory_space<vmem>>, vector<1x1x16x16xf32>
    %158 = vector.shape_cast %157 : vector<1x1x16x16xf32> to vector<16x16xf32>
    %159 = vector.shape_cast %156 : vector<16x16xf32> to vector<1x1x16x16xf32>
    tpu.vector_store %arg12[%c0_148, %c0_149, %c0_150, %c0_151], %159 {strides = array<i32>} : memref<1x2x16x16xf32, #tpu.memory_space<vmem>>, vector<1x1x16x16xf32>,
    %c0_152 = arith.constant 0 : index
    %c1_153 = arith.constant 1 : index
    %c0_154 = arith.constant 0 : index
    %c0_155 = arith.constant 0 : index
    %160 = vector.load %arg12[%c0_152, %c1_153, %c0_154, %c0_155] : memref<1x2x16x16xf32, #tpu.memory_space<vmem>>, vector<1x1x16x16xf32>
    %161 = vector.shape_cast %160 : vector<1x1x16x16xf32> to vector<16x16xf32>
    %162 = arith.mulf %146, %148 : vector<16x16xf32>
    %163 = arith.mulf %144, %150 : vector<16x16xf32>
    %164 = arith.subf %162, %163 : vector<16x16xf32>
    %165 = arith.addf %161, %164 : vector<16x16xf32>
    %c0_156 = arith.constant 0 : index
    %c1_157 = arith.constant 1 : index
    %c0_158 = arith.constant 0 : index
    %c0_159 = arith.constant 0 : index
    %166 = vector.load %arg12[%c0_156, %c1_157, %c0_158, %c0_159] : memref<1x2x16x16xf32, #tpu.memory_space<vmem>>, vector<1x1x16x16xf32>
    %167 = vector.shape_cast %166 : vector<1x1x16x16xf32> to vector<16x16xf32>
    %168 = vector.shape_cast %165 : vector<16x16xf32> to vector<1x1x16x16xf32>
    tpu.vector_store %arg12[%c0_156, %c1_157, %c0_158, %c0_159], %168 {strides = array<i32>} : memref<1x2x16x16xf32, #tpu.memory_space<vmem>>, vector<1x1x16x16xf32>,
    %c0_160 = arith.constant 0 : index
    %c4 = arith.constant 4 : index
    %c0_161 = arith.constant 0 : index
    %c0_162 = arith.constant 0 : index
    %169 = vector.load %arg2[%c0_160, %c4, %c0_161, %c0_162] : memref<1x5x16x16xf32, #tpu.memory_space<vmem>>, vector<1x1x16x16xf32>
    %170 = vector.shape_cast %169 : vector<1x1x16x16xf32> to vector<16x16xf32>
    %c0_163 = arith.constant 0 : index
    %c4_164 = arith.constant 4 : index
    %c0_165 = arith.constant 0 : index
    %c0_166 = arith.constant 0 : index
    %171 = vector.load %arg3[%c0_163, %c4_164, %c0_165, %c0_166] : memref<1x5x16x16xf32, #tpu.memory_space<vmem>>, vector<1x1x16x16xf32>
    %172 = vector.shape_cast %171 : vector<1x1x16x16xf32> to vector<16x16xf32>
    %cst_167 = arith.constant dense<0.000000e+00> : vector<16x16xf32>
    %173 = tpu.matmul %170, %5, %cst_167 {dimension_numbers = #tpu.dot_dimension_numbers<[1], [0], [0], [1], [0, 0, 1, 1], [], []>} : vector<16x16xf32>, vector<16x16xf32>, vector<16x16xf32> -> vector<16x16xf32>
    %cst_168 = arith.constant dense<0.000000e+00> : vector<16x16xf32>
    %174 = tpu.matmul %172, %6, %cst_168 {dimension_numbers = #tpu.dot_dimension_numbers<[1], [0], [0], [1], [0, 0, 1, 1], [], []>} : vector<16x16xf32>, vector<16x16xf32>, vector<16x16xf32> -> vector<16x16xf32>
    %175 = arith.addf %170, %172 : vector<16x16xf32>
    %cst_169 = arith.constant dense<0.000000e+00> : vector<16x16xf32>
    %176 = tpu.matmul %175, %8, %cst_169 {dimension_numbers = #tpu.dot_dimension_numbers<[1], [0], [0], [1], [0, 0, 1, 1], [], []>} : vector<16x16xf32>, vector<16x16xf32>, vector<16x16xf32> -> vector<16x16xf32>
    %177 = arith.subf %173, %174 : vector<16x16xf32>
    %178 = arith.subf %176, %173 : vector<16x16xf32>
    %179 = arith.subf %178, %174 : vector<16x16xf32>
    %cst_170 = arith.constant dense<0.000000e+00> : vector<16x16xf32>
    %180 = tpu.matmul %3, %177, %cst_170 {dimension_numbers = #tpu.dot_dimension_numbers<[1], [0], [0], [1], [0, 0, 1, 1], [], []>} : vector<16x16xf32>, vector<16x16xf32>, vector<16x16xf32> -> vector<16x16xf32>
    %cst_171 = arith.constant dense<0.000000e+00> : vector<16x16xf32>
    %181 = tpu.matmul %4, %179, %cst_171 {dimension_numbers = #tpu.dot_dimension_numbers<[1], [0], [0], [1], [0, 0, 1, 1], [], []>} : vector<16x16xf32>, vector<16x16xf32>, vector<16x16xf32> -> vector<16x16xf32>
    %182 = arith.addf %177, %179 : vector<16x16xf32>
    %cst_172 = arith.constant dense<0.000000e+00> : vector<16x16xf32>
    %183 = tpu.matmul %7, %182, %cst_172 {dimension_numbers = #tpu.dot_dimension_numbers<[1], [0], [0], [1], [0, 0, 1, 1], [], []>} : vector<16x16xf32>, vector<16x16xf32>, vector<16x16xf32> -> vector<16x16xf32>
    %184 = arith.subf %180, %181 : vector<16x16xf32>
    %185 = arith.subf %183, %180 : vector<16x16xf32>
    %186 = arith.subf %185, %181 : vector<16x16xf32>
    %c0_173 = arith.constant 0 : index
    %c4_174 = arith.constant 4 : index
    %c0_175 = arith.constant 0 : index
    %c0_176 = arith.constant 0 : index
    %187 = vector.load %arg4[%c0_173, %c4_174, %c0_175, %c0_176] : memref<1x5x16x16xf32, #tpu.memory_space<vmem>>, vector<1x1x16x16xf32>
    %188 = vector.shape_cast %187 : vector<1x1x16x16xf32> to vector<16x16xf32>
    %c0_177 = arith.constant 0 : index
    %c4_178 = arith.constant 4 : index
    %c0_179 = arith.constant 0 : index
    %c0_180 = arith.constant 0 : index
    %189 = vector.load %arg5[%c0_177, %c4_178, %c0_179, %c0_180] : memref<1x5x16x16xf32, #tpu.memory_space<vmem>>, vector<1x1x16x16xf32>
    %190 = vector.shape_cast %189 : vector<1x1x16x16xf32> to vector<16x16xf32>
    %c0_181 = arith.constant 0 : index
    %c0_182 = arith.constant 0 : index
    %c0_183 = arith.constant 0 : index
    %c0_184 = arith.constant 0 : index
    %191 = vector.load %arg12[%c0_181, %c0_182, %c0_183, %c0_184] : memref<1x2x16x16xf32, #tpu.memory_space<vmem>>, vector<1x1x16x16xf32>
    %192 = vector.shape_cast %191 : vector<1x1x16x16xf32> to vector<16x16xf32>
    %193 = arith.mulf %184, %188 : vector<16x16xf32>
    %194 = arith.mulf %186, %190 : vector<16x16xf32>
    %195 = arith.addf %193, %194 : vector<16x16xf32>
    %196 = arith.addf %192, %195 : vector<16x16xf32>
    %c0_185 = arith.constant 0 : index
    %c0_186 = arith.constant 0 : index
    %c0_187 = arith.constant 0 : index
    %c0_188 = arith.constant 0 : index
    %197 = vector.load %arg12[%c0_185, %c0_186, %c0_187, %c0_188] : memref<1x2x16x16xf32, #tpu.memory_space<vmem>>, vector<1x1x16x16xf32>
    %198 = vector.shape_cast %197 : vector<1x1x16x16xf32> to vector<16x16xf32>
    %199 = vector.shape_cast %196 : vector<16x16xf32> to vector<1x1x16x16xf32>
    tpu.vector_store %arg12[%c0_185, %c0_186, %c0_187, %c0_188], %199 {strides = array<i32>} : memref<1x2x16x16xf32, #tpu.memory_space<vmem>>, vector<1x1x16x16xf32>,
    %c0_189 = arith.constant 0 : index
    %c1_190 = arith.constant 1 : index
    %c0_191 = arith.constant 0 : index
    %c0_192 = arith.constant 0 : index
    %200 = vector.load %arg12[%c0_189, %c1_190, %c0_191, %c0_192] : memref<1x2x16x16xf32, #tpu.memory_space<vmem>>, vector<1x1x16x16xf32>
    %201 = vector.shape_cast %200 : vector<1x1x16x16xf32> to vector<16x16xf32>
    %202 = arith.mulf %186, %188 : vector<16x16xf32>
    %203 = arith.mulf %184, %190 : vector<16x16xf32>
    %204 = arith.subf %202, %203 : vector<16x16xf32>
    %205 = arith.addf %201, %204 : vector<16x16xf32>
    %c0_193 = arith.constant 0 : index
    %c1_194 = arith.constant 1 : index
    %c0_195 = arith.constant 0 : index
    %c0_196 = arith.constant 0 : index
    %206 = vector.load %arg12[%c0_193, %c1_194, %c0_195, %c0_196] : memref<1x2x16x16xf32, #tpu.memory_space<vmem>>, vector<1x1x16x16xf32>
    %207 = vector.shape_cast %206 : vector<1x1x16x16xf32> to vector<16x16xf32>
    %208 = vector.shape_cast %205 : vector<16x16xf32> to vector<1x1x16x16xf32>
    tpu.vector_store %arg12[%c0_193, %c1_194, %c0_195, %c0_196], %208 {strides = array<i32>} : memref<1x2x16x16xf32, #tpu.memory_space<vmem>>, vector<1x1x16x16xf32>,
    return
  }
  func.func @transform_0(%arg0: i32, %arg1: i32) -> (i32, i32, i32, i32) {
    %c0_i32 = arith.constant 0 : i32
    %c0_i32_0 = arith.constant 0 : i32
    %c0_i32_1 = arith.constant 0 : i32
    return %arg0, %arg1, %c0_i32, %c0_i32_0 : i32, i32, i32, i32
  }
  func.func @transform_1(%arg0: i32, %arg1: i32) -> (i32, i32, i32, i32) {
    %c0_i32 = arith.constant 0 : i32
    %c0_i32_0 = arith.constant 0 : i32
    %c0_i32_1 = arith.constant 0 : i32
    return %arg0, %arg1, %c0_i32, %c0_i32_0 : i32, i32, i32, i32
  }
  func.func @transform_2(%arg0: i32, %arg1: i32) -> (i32, i32, i32, i32) {
    %c0_i32 = arith.constant 0 : i32
    %c0_i32_0 = arith.constant 0 : i32
    %c0_i32_1 = arith.constant 0 : i32
    return %arg0, %arg1, %c0_i32, %c0_i32_0 : i32, i32, i32, i32
  }
  func.func @transform_3(%arg0: i32, %arg1: i32) -> (i32, i32, i32, i32) {
    %c0_i32 = arith.constant 0 : i32
    %c0_i32_0 = arith.constant 0 : i32
    %c0_i32_1 = arith.constant 0 : i32
    return %arg0, %arg1, %c0_i32, %c0_i32_0 : i32, i32, i32, i32
  }
  func.func @transform_4(%arg0: i32, %arg1: i32) -> (i32, i32) {
    %c0_i32 = arith.constant 0 : i32
    %c0_i32_0 = arith.constant 0 : i32
    %c0_i32_1 = arith.constant 0 : i32
    return %c0_i32, %c0_i32_0 : i32, i32
  }
  func.func @transform_5(%arg0: i32, %arg1: i32) -> (i32, i32) {
    %c0_i32 = arith.constant 0 : i32
    %c0_i32_0 = arith.constant 0 : i32
    %c0_i32_1 = arith.constant 0 : i32
    return %c0_i32, %c0_i32_0 : i32, i32
  }
  func.func @transform_6(%arg0: i32, %arg1: i32) -> (i32, i32) {
    %c0_i32 = arith.constant 0 : i32
    %c0_i32_0 = arith.constant 0 : i32
    %c0_i32_1 = arith.constant 0 : i32
    return %c0_i32, %c0_i32_0 : i32, i32
  }
  func.func @transform_7(%arg0: i32, %arg1: i32) -> (i32, i32) {
    %c0_i32 = arith.constant 0 : i32
    %c0_i32_0 = arith.constant 0 : i32
    %c0_i32_1 = arith.constant 0 : i32
    return %c0_i32, %c0_i32_0 : i32, i32
  }
  func.func @transform_8(%arg0: i32, %arg1: i32) -> (i32, i32) {
    %c0_i32 = arith.constant 0 : i32
    %c0_i32_0 = arith.constant 0 : i32
    %c0_i32_1 = arith.constant 0 : i32
    return %c0_i32, %c0_i32_0 : i32, i32
  }
  func.func @transform_9(%arg0: i32, %arg1: i32) -> (i32, i32) {
    %c0_i32 = arith.constant 0 : i32
    %c0_i32_0 = arith.constant 0 : i32
    %c0_i32_1 = arith.constant 0 : i32
    return %c0_i32, %c0_i32_0 : i32, i32
  }
  func.func @transform_10(%arg0: i32, %arg1: i32) -> (i32, i32, i32, i32) {
    %c0_i32 = arith.constant 0 : i32
    %c0_i32_0 = arith.constant 0 : i32
    %c0_i32_1 = arith.constant 0 : i32
    %c0_i32_2 = arith.constant 0 : i32
    return %arg0, %c0_i32, %c0_i32_0, %c0_i32_1 : i32, i32, i32, i32
  }
}

</mosaic_0001>

<bundles_post_ra>
// kernel: tpu_custom_call.1
= control target key start
LH: loop header
LB: loop body
LE: loop exit
PB: predicated region body
PF: predicated region fallthrough
CT: control target
= control target key end

     0   :  { %s5281_s0 = inlined_call_operand.hbm [shape: f32[2,5,16,16], index: 0, kind: input, shape index: {}]   ;;  %s5282_s1 = inlined_call_operand.hbm [shape: f32[2,5,16,16], index: 1, kind: input, shape index: {}]   ;;  %s5283_s2 = inlined_call_operand.hbm [shape: f32[2,5,16,16], index: 2, kind: input, shape index: {}]   ;;  %s5284_s3 = inlined_call_operand.hbm [shape: f32[2,5,16,16], index: 3, kind: input, shape index: {}]   ;;  %s5285_s4 = inlined_call_operand.hbm [shape: f32[16,16], index: 4, kind: input, shape index: {}]   ;;  %s5286_s5 = inlined_call_operand.vmem [shape: f32[16,16], index: 5, kind: input, shape index: {}]   ;;  %s5287_s6 = inlined_call_operand.hbm [shape: f32[16,16], index: 6, kind: input, shape index: {}]   ;;  %s5288_s7 = inlined_call_operand.hbm [shape: f32[16,16], index: 7, kind: input, shape index: {}]   ;;  %s5289_s8 = inlined_call_operand.hbm [shape: f32[16,16], index: 8, kind: input, shape index: {}]   ;;  %s5290_s9 = inlined_call_operand.vmem [shape: f32[16,16], index: 9, kind: input, shape index: {}]   ;;  %s5291_s10 = inlined_call_operand.hbm [shape: f32[2,2,16,16], index: 10, kind: output, shape index: {}]  }
   0x1   :  { %5320 = sst [smem:[#allocation32_spill]] %s5282_s1 }
   0x2   :  { %5321 = sst [smem:[#allocation33_spill]] %s5285_s4 }
   0x3   :  { %5322 = sst [smem:[#allocation34_spill]] %s5286_s5 }
   0x4   :  { %5323 = sst [smem:[#allocation35_spill]] %s5287_s6 }
   0x5   :  { %5324 = sst [smem:[#allocation36_spill]] %s5290_s9 }
   0x6   :  { %5325 = sst [smem:[#allocation37_spill]] %s5291_s10 }
   0x7   :  { %15 = vsyncpa [#allocation3], 0 }
   0x8   :  { %17 = vsyncpa [#allocation3 + $0x1], 0 }
   0x9   :  { %18 = vsyncpa [#allocation6], 0 }
   0xa   :  { %20 = vsyncpa [#allocation6 + $0x1], 0 }
   0xb   :  { %21 = vsyncpa [#allocation9], 0 }
   0xc   :  { %23 = vsyncpa [#allocation9 + $0x1], 0 }
   0xd   :  { %24 = vsyncpa [#allocation12], 0 }
   0xe   :  { %25 = vsyncpa [#allocation15], 0 }
   0xf   :  { %26 = vsyncpa [#allocation4], 0 }
  0x10   :  { %28 = vsyncpa [#allocation4 + $0x1], 0  ;;  %s4560_s13 = smov 0   ;;  %s4562_s14 = smov 0  }
  0x11   :  { %s4564_s15 = smov 0   ;;  %s4566_s16 = smov 0  }
  0x12   :  { %s4568_s17 = smov 0   ;;  %s4570_s18 = smov 0  }
  0x13 LB: > { %5326 = sst [smem:[#allocation24_spill]] %s4469_s13  ;;  %s4591_s19 = sadd.s32 4294967295, %s4489_s18   ;;  %s4489_s18 = sphi %s4570_s18, %s34_s18   ;;  %s4485_s17 = sphi %s4568_s17, %s5375_s17   ;;  %s4481_s16 = sphi %s4566_s16, %s5374_s16   ;;  %s4477_s15 = sphi %s4564_s15, %s5378_s15   ;;  %s4473_s14 = sphi %s4562_s14, %s5377_s14   ;;  %s4469_s13 = sphi %s4560_s13, %s5376_s13  }
  0x14   : > { %5327 = sst [smem:[#allocation25_spill]] %s4481_s16  ;;  %s3438_s20 = sadd.s32 4294967294, %s4489_s18  }
  0x15   : > { %5328 = sst [smem:[#allocation26_spill]] %s4485_s17  ;;  %p5295_p0 = scmp.ne.s32.totalorder %s4477_s15, %s4473_s14 }
  0x16   : > { %5329 = sst [smem:[#allocation27_spill]] %s4591_s19  ;;  %p68_p1 = scmp.ne.s32.totalorder %s4473_s14, %s4469_s13 }
  0x17   : > { %p5294_p2 = scmp.eq.s32.totalorder %s4591_s19, 0  ;;  %p302_p3 = scmp.eq.s32.totalorder %s4591_s19, 1 }
  0x18   : > { %p308_p4 = scmp.eq.s32.totalorder %s3438_s20, 1  ;;  %p3439_p5 = scmp.ge.s32.totalorder %s4489_s18, 1 }
  0x19   : > { %p4603_p6 = por %p5294_p2, %p68_p1  ;;  %p4610_p7 = por %p302_p3, %p5295_p0 }
  0x1a   : > { %p4614_p8 = por %p308_p4, %p68_p1  ;;  %p315_p9 = scmp.lt.s32.totalorder %s4489_s18, 3 }
  0x1b   : > { %s5330_s21 = scalar_select %p4603_p6, 1, 0 }
  0x1c   : > { %s5331_s22 = scalar_select %p4610_p7, 1, 0 }
  0x1d   : > { %s5333_s23 = scalar_select %p4614_p8, 1, 0 }
  0x1e   : > { %5332 = sst [smem:[#allocation28_spill]] %s5331_s22  ;;  %p4619_p10 = pnand %p3439_p5, %p315_p9 }
  0x1f   : > { %5334 = sst [smem:[#allocation29_spill]] %s5333_s23  ;;  %s4491_s25 = smov [#allocation10]  }
  0x20   : > { %s5335_s24 = scalar_select %p4619_p10, 1, 0 }
  0x21   : > { %s327_s26 = sshll.u32 %s4491_s25, 4  ;;  %p4058_p11 = pneg %p4619_p10  ;;  %s4623_s26 = int_to_ptr.vmem [resolvable:$true] %s327_s26 }
  0x22   : > { %s4492_s28 = smov [#allocation11]   ;;  %s5337_s4 = sld [smem:[#allocation33_spill]] }
  0x23   : > { %p4630_p13 = pnand %p4058_p11, %p5294_p2  ;;  %s343_s29 = sshll.u32 %s4492_s28, 4  ;;  %s4634_s29 = int_to_ptr.vmem [resolvable:$true] %s343_s29 }
  0x25   : > { %s5336_s27 = scalar_select %p4630_p13, 1, 0 }
  0x26   : > { %p4644_p3 = pneg %p4630_p13 }
  0x28   : > { %s4155_s12 = scalar_lea.hbm %s5337_s4, 256 }
  0x29   : > { %p4156_p1 = scmp.ne.s32.totalorder %s5337_s4, %s4155_s12  ;;  %p4162_p9 = scmp.lt.u32.totalorder %s4155_s12, %s5337_s4 }
  0x2a   : > { %s5338_s23 = scalar_select %p4644_p3, 1, 0 }
  0x2b   : > { %p4158_p4 = pnand %p4644_p3, %p4156_p1 }
  0x2d   : > { %p4159_p5 = pneg %p4158_p4 }
  0x2f   : > { %p4164_p11 = pnand %p4162_p9, %p4159_p5 }
  0x31   : > { %4167 = shalt.err (!%p4164_p11)
}
  0x32   : > { %s4168_s30 = scalar_lea.vmem %s4623_s26, 256  ;;  %p4176_p8 = scmp.lt.s32.totalorder %s4623_s26, %s4623_s26 }
  0x33   : > { %p4169_p12 = scmp.ne.s32.totalorder %s4623_s26, %s4168_s30  ;;  %p4177_p7 = scmp.lt.s32.totalorder %s4168_s30, %s4168_s30 }
  0x35   : > { %p4171_p2 = pnand %p4169_p12, %p4644_p3  ;;  %p4178_p1 = por %p4177_p7, %p4176_p8 }
  0x37   : > { %p4172_p0 = pneg %p4171_p2 }
  0x39   : > { %p4179_p4 = pnand %p4178_p1, %p4172_p0 }
  0x3b   : > { %4182 = shalt.err (!%p4179_p4)
}
  0x3c   : > { %s5301_s11 = smov 128   ;;  %s5304_s13 = smov 8  }
  0x3d   : > { %4061 = dma.hbm_to_vmem [thread:$0]  (!%p4630_p13), %s5337_s4, 256, %s4623_s26, [#allocation9], %s5301_s11, %s5301_s11, %s5304_s13  }
  0x3e   : > { %s5339_s6 = sld [smem:[#allocation35_spill]] }
  0x44   : > { %s4183_s30 = scalar_lea.hbm %s5339_s6, 256 }
  0x45   : > { %p4184_p0 = scmp.ne.s32.totalorder %s5339_s6, %s4183_s30  ;;  %p4190_p8 = scmp.lt.u32.totalorder %s4183_s30, %s5339_s6 }
  0x47   : > { %p4186_p2 = pnand %p4184_p0, %p4644_p3 }
  0x49   : > { %p4187_p7 = pneg %p4186_p2 }
  0x4b   : > { %p4192_p12 = pnand %p4190_p8, %p4187_p7 }
  0x4d   : > { %4195 = shalt.err (!%p4192_p12)
}
  0x4e   : > { %s4196_s26 = scalar_lea.vmem %s4634_s29, 256  ;;  %p4204_p1 = scmp.lt.s32.totalorder %s4634_s29, %s4634_s29 }
  0x4f   : > { %p4197_p5 = scmp.ne.s32.totalorder %s4634_s29, %s4196_s26  ;;  %p4205_p4 = scmp.lt.s32.totalorder %s4196_s26, %s4196_s26 }
  0x51   : > { %p4199_p9 = pnand %p4197_p5, %p4644_p3  ;;  %p4206_p0 = por %p4205_p4, %p4204_p1 }
  0x53   : > { %p4200_p11 = pneg %p4199_p9 }
  0x55   : > { %p4207_p2 = pnand %p4206_p0, %p4200_p11 }
  0x57   : > { %4210 = shalt.err (!%p4207_p2)
}
  0x58   : > { %4064 = dma.hbm_to_vmem [thread:$0]  (!%p4630_p13), %s5339_s6, 256, %s4634_s29, [#allocation12], %s5301_s11, %s5301_s11, %s5304_s13  }
  0x59   : > { %s46_s16 = sadd.s32 1, %s4485_s17  ;;  %s55_s22 = sadd.s32 1, %s4477_s15 }
  0x5a   : > { %p48_p7 = scmp.ge.s32.totalorder %s46_s16, 2  ;;  %p63_p8 = scmp.eq.s32.totalorder %s4489_s18, 0 }
  0x5b   : > { %p4092_p12 = scmp.lt.s32.totalorder %s4489_s18, 2  ;;  %s5303_s12 = sand.u32 1, %s4477_s15  }
  0x5c   : > { %s5380_s16 = smov (%p48_p7, %s46_s16), 0  ;;  %p5341_p5 = scmp.ne.s32.totalorder %s4477_s15, %s4473_s14 }
  0x5d   : > { %5340 = sst [smem:[#allocation30_spill]] %s5380_s16  ;;  %s4706_s20 = smul.u32 80, %s5303_s12 }
  0x5e   : > { %p64_p9 = por %p63_p8, %p5341_p5  ;;  %s50_s25 = ssub.s32 %s4485_s17, %s5380_s16 }
  0x5f   : > { %s4711_s28 = smul.u32 1280, %s4485_s17  ;;  %p53_p11 = scmp.eq.s32.totalorder %s50_s25, 0 }
  0x60   : > { %p4713_p1 = pnand %p4092_p12, %p64_p9  ;;  %s5308_s30 = sand.u32 1, %s4489_s18  }
  0x61   : > { %s4719_s26 = scalar_select %p53_p11, %s4477_s15, %s55_s22  }
  0x62   : > { %s5342_s29 = scalar_select %p4713_p1, 1, 0 }
  0x63   : > { %5343 = sst [smem:[#allocation31_spill]] %s4719_s26  ;;  %s414_s12 = scalar_lea.vmem [#allocation5], %s4706_s20 }
  0x64   : > { %s5344_s1 = sld [smem:[#allocation32_spill]]  ;;  %s424_s13 = sshll.u32 %s414_s12, 4  ;;  %s4728_s13 = int_to_ptr.vmem [resolvable:$true] %s424_s13 }
  0x65   : > { %s4732_s25 = scalar_lea.sflag [#allocation6], %s5308_s30  ;;  %p4738_p0 = pneg %p4713_p1 }
  0x6a   : > { %s4725_s11 = scalar_lea.hbm %s5344_s1, %s4711_s28  ;;  %s4216_s12 = scalar_lea.hbm %s5344_s1, 2560 }
  0x6b   : > { %s4211_s4 = scalar_lea.hbm %s4725_s11, 1280  ;;  %p4217_p8 = scmp.lt.u32.totalorder %s4725_s11, %s5344_s1 }
  0x6c   : > { %p4212_p4 = scmp.ne.s32.totalorder %s4725_s11, %s4211_s4  ;;  %p4218_p12 = scmp.lt.u32.totalorder %s4216_s12, %s4211_s4 }
  0x6d   : > { %p4220_p9 = scmp.lt.u32.totalorder %s4211_s4, %s4725_s11 }
  0x6e   : > { %p4214_p2 = pnand %p4738_p0, %p4212_p4  ;;  %p4219_p5 = por %p4218_p12, %p4217_p8 }
  0x70   : > { %p4215_p7 = pneg %p4214_p2  ;;  %p4221_p11 = por %p4220_p9, %p4219_p5 }
  0x72   : > { %p4222_p6 = pnand %p4221_p11, %p4215_p7 }
  0x74   : > { %4225 = shalt.err (!%p4222_p6)
}
  0x75   : > { %s4226_s30 = scalar_lea.vmem %s4728_s13, 1280  ;;  %s4495_s5 = smov [#allocation5]  }
  0x76   : > { %p4227_p4 = scmp.ne.s32.totalorder %s4728_s13, %s4226_s30  ;;  %s4231_s10 = sshll.u32 %s4495_s5, 4  ;;  %s4232_s10 = int_to_ptr.vmem [resolvable:$false] %s4231_s10 }
  0x77   : > { %s4233_s6 = scalar_lea.vmem %s4232_s10, 2560  ;;  %p4234_p13 = scmp.lt.s32.totalorder %s4728_s13, %s4232_s10 }
  0x78   : > { %p4229_p2 = pnand %p4227_p4, %p4738_p0  ;;  %p4235_p3 = scmp.lt.s32.totalorder %s4233_s6, %s4226_s30 }
  0x7a   : > { %p4230_p10 = pneg %p4229_p2  ;;  %p4236_p8 = por %p4235_p3, %p4234_p13 }
  0x7c   : > { %p4237_p12 = pnand %p4236_p8, %p4230_p10 }
  0x7e   : > { %4240 = shalt.err (!%p4237_p12)
}
  0x7f   : > { %s5346_s4 = smov 8   ;;  %s5347_s16 = smov 128  }
  0x80   : > { %4077 = dma.hbm_to_vmem [thread:$0]  (!%p4713_p1), %s4725_s11, 1280, %s4728_s13, %s4732_s25, %s5347_s16, %s5347_s16, %s5346_s4  }
  0x81   : > { %s4496_s12 = smov [#allocation13]   ;;  %s4497_s5 = smov [#allocation14]  }
  0x82   : > { %s356_s1 = sshll.u32 %s4496_s12, 4  ;;  %s369_s17 = sshll.u32 %s4497_s5, 4  ;;  %s357_s1 = int_to_ptr.vmem [resolvable:$true] %s356_s1  ;;  %s4765_s17 = int_to_ptr.vmem [resolvable:$true] %s369_s17 }
  0x83   : > { %s4241_s6 = scalar_lea.hbm %s5288_s7, 256  ;;  %p5348_p10 = scmp.ne.s32.totalorder %s5338_s23, 0 }
  0x84   : > { %p4242_p6 = scmp.ne.s32.totalorder %s5288_s7, %s4241_s6  ;;  %p4248_p7 = scmp.lt.u32.totalorder %s4241_s6, %s5288_s7 }
  0x86   : > { %p4244_p13 = pnand %p4242_p6, %p5348_p10 }
  0x88   : > { %p4245_p3 = pneg %p4244_p13 }
  0x8a   : > { %p4250_p5 = pnand %p4248_p7, %p4245_p3 }
  0x8c   : > { %4253 = shalt.err (!%p4250_p5)
}
  0x8d   : > { %s4254_s13 = scalar_lea.vmem %s357_s1, 256  ;;  %p4262_p2 = scmp.lt.s32.totalorder %s357_s1, %s357_s1 }
  0x8e   : > { %p4255_p9 = scmp.ne.s32.totalorder %s357_s1, %s4254_s13  ;;  %p4263_p8 = scmp.lt.s32.totalorder %s4254_s13, %s4254_s13 }
  0x90   : > { %p4257_p11 = pnand %p4255_p9, %p5348_p10  ;;  %p4264_p12 = por %p4263_p8, %p4262_p2 }
  0x92   : > { %p4258_p4 = pneg %p4257_p11 }
  0x94   : > { %p4265_p1 = pnand %p4264_p12, %p4258_p4 }
  0x96   : > { %4268 = shalt.err (!%p4265_p1)
}
  0x97   : > { %p5349_p6 = scmp.ne.s32.totalorder %s5336_s27, 0  ;;  %s4269_s5 = scalar_lea.hbm %s5289_s8, 256 }
  0x98   : > { %p4270_p13 = scmp.ne.s32.totalorder %s5289_s8, %s4269_s5  ;;  %p4276_p7 = scmp.lt.u32.totalorder %s4269_s5, %s5289_s8 }
  0x99   : > { %4067 = dma.hbm_to_vmem [thread:$0]  (!%p5349_p6), %s5288_s7, 256, %s357_s1, [#allocation12], %s5347_s16, %s5347_s16, %s5346_s4  }
  0x9a   : > { %p4272_p1 = pnand %p4270_p13, %p5348_p10 }
  0x9c   : > { %p4273_p3 = pneg %p4272_p1 }
  0x9e   : > { %p4278_p5 = pnand %p4276_p7, %p4273_p3 }
  0xa0   : > { %4281 = shalt.err (!%p4278_p5)
}
  0xa1   : > { %s4282_s1 = scalar_lea.vmem %s4765_s17, 256  ;;  %p4290_p2 = scmp.lt.s32.totalorder %s4765_s17, %s4765_s17 }
  0xa2   : > { %p4283_p9 = scmp.ne.s32.totalorder %s4765_s17, %s4282_s1  ;;  %p4291_p8 = scmp.lt.s32.totalorder %s4282_s1, %s4282_s1 }
  0xa4   : > { %p4285_p11 = pnand %p4283_p9, %p5348_p10  ;;  %p4292_p12 = por %p4291_p8, %p4290_p2 }
  0xa6   : > { %p4286_p4 = pneg %p4285_p11 }
  0xa8   : > { %p4293_p13 = pnand %p4292_p12, %p4286_p4 }
  0xaa   : > { %4296 = shalt.err (!%p4293_p13)
}
  0xab   : > { %4070 = dma.hbm_to_vmem [thread:$0]  (!%p5349_p6), %s5289_s8, 256, %s4765_s17, [#allocation15], %s5347_s16, %s5347_s16, %s5346_s4  }
  0xac   : > { %s4818_s26 = scalar_lea.hbm %s5281_s0, %s4711_s28  ;;  %s390_s27 = scalar_lea.vmem [#allocation2], %s4706_s20 }
  0xad   : > { %s400_s12 = sshll.u32 %s390_s27, 4  ;;  %s5350_s5 = sand.u32 1, %s4477_s15   ;;  %s4821_s12 = int_to_ptr.vmem [resolvable:$true] %s400_s12 }
  0xae   : > { %s4825_s30 = scalar_lea.sflag [#allocation3], %s5350_s5  ;;  %s4297_s10 = scalar_lea.hbm %s4818_s26, 1280 }
  0xaf   : > { %p4298_p10 = scmp.ne.s32.totalorder %s4818_s26, %s4297_s10  ;;  %s4302_s11 = scalar_lea.hbm %s5281_s0, 2560 }
  0xb0   : > { %p4303_p3 = scmp.lt.u32.totalorder %s4818_s26, %s5281_s0  ;;  %p4304_p7 = scmp.lt.u32.totalorder %s4302_s11, %s4297_s10 }
  0xb1   : > { %p4300_p6 = pnand %p4298_p10, %p4738_p0  ;;  %p4306_p9 = scmp.lt.u32.totalorder %s4297_s10, %s4818_s26 }
  0xb2   : > { %p4305_p5 = por %p4304_p7, %p4303_p3 }
  0xb3   : > { %p4301_p1 = pneg %p4300_p6 }
  0xb4   : > { %p4307_p11 = por %p4306_p9, %p4305_p5 }
  0xb6   : > { %p4308_p4 = pnand %p4307_p11, %p4301_p1 }
  0xb8   : > { %4311 = shalt.err (!%p4308_p4)
}
  0xb9   : > { %s4312_s9 = scalar_lea.vmem %s4821_s12, 1280  ;;  %s4498_s23 = smov [#allocation2]  }
  0xba   : > { %p4313_p2 = scmp.ne.s32.totalorder %s4821_s12, %s4312_s9  ;;  %s4317_s19 = sshll.u32 %s4498_s23, 4  ;;  %s4318_s19 = int_to_ptr.vmem [resolvable:$false] %s4317_s19 }
  0xbb   : > { %s4319_s27 = scalar_lea.vmem %s4318_s19, 2560  ;;  %p4320_p13 = scmp.lt.s32.totalorder %s4821_s12, %s4318_s19 }
  0xbc   : > { %p4315_p8 = pnand %p4313_p2, %p4738_p0  ;;  %p4321_p10 = scmp.lt.s32.totalorder %s4319_s27, %s4312_s9 }
  0xbe   : > { %p4316_p12 = pneg %p4315_p8  ;;  %p4322_p6 = por %p4321_p10, %p4320_p13 }
  0xc0   : > { %p4323_p3 = pnand %p4322_p6, %p4316_p12 }
  0xc2   : > { %4326 = shalt.err (!%p4323_p3)
}
  0xc3   : > { %p5351_p1 = scmp.ne.s32.totalorder %s5342_s29, 0  ;;  %s4856_s17 = scalar_lea.hbm %s5283_s2, %s4711_s28 }
  0xc4   : > { %s438_s6 = scalar_lea.vmem [#allocation7], %s4706_s20  ;;  %s4327_s1 = scalar_lea.hbm %s4856_s17, 1280 }
  0xc5   : > { %4074 = dma.hbm_to_vmem [thread:$0]  (!%p5351_p1), %s4818_s26, 1280, %s4821_s12, %s4825_s30, %s5347_s16, %s5347_s16, %s5346_s4  }
  0xc6   : > { %s448_s11 = sshll.u32 %s438_s6, 4  ;;  %p4328_p7 = scmp.ne.s32.totalorder %s4856_s17, %s4327_s1  ;;  %s4859_s11 = int_to_ptr.vmem [resolvable:$true] %s448_s11 }
  0xc7   : > { %s4332_s12 = scalar_lea.hbm %s5283_s2, 2560  ;;  %p4333_p11 = scmp.lt.u32.totalorder %s4856_s17, %s5283_s2 }
  0xc8   : > { %p4330_p5 = pnand %p4328_p7, %p4738_p0  ;;  %p4334_p4 = scmp.lt.u32.totalorder %s4332_s12, %s4327_s1 }
  0xc9   : > { %p4336_p8 = scmp.lt.u32.totalorder %s4327_s1, %s4856_s17 }
  0xca   : > { %p4331_p9 = pneg %p4330_p5  ;;  %p4335_p2 = por %p4334_p4, %p4333_p11 }
  0xcc   : > { %p4337_p12 = por %p4336_p8, %p4335_p2 }
  0xce   : > { %p4338_p13 = pnand %p4337_p12, %p4331_p9 }
  0xd0   : > { %4341 = shalt.err (!%p4338_p13)
}
  0xd1   : > { %s4342_s23 = scalar_lea.vmem %s4859_s11, 1280  ;;  %s4499_s19 = smov [#allocation7]  }
  0xd2   : > { %p4343_p10 = scmp.ne.s32.totalorder %s4859_s11, %s4342_s23  ;;  %s4347_s27 = sshll.u32 %s4499_s19, 4  ;;  %s4348_s27 = int_to_ptr.vmem [resolvable:$false] %s4347_s27 }
  0xd3   : > { %s4349_s5 = scalar_lea.vmem %s4348_s27, 2560  ;;  %p4350_p7 = scmp.lt.s32.totalorder %s4859_s11, %s4348_s27 }
  0xd4   : > { %p4345_p6 = pnand %p4343_p10, %p4738_p0  ;;  %p4351_p5 = scmp.lt.s32.totalorder %s4349_s5, %s4342_s23 }
  0xd6   : > { %p4346_p3 = pneg %p4345_p6  ;;  %p4352_p11 = por %p4351_p5, %p4350_p7 }
  0xd8   : > { %p4353_p4 = pnand %p4352_p11, %p4346_p3 }
  0xda   : > { %4356 = shalt.err (!%p4353_p4)
}
  0xdb   : > { %4080 = dma.hbm_to_vmem [thread:$0]  (!%p5351_p1), %s4856_s17, 1280, %s4859_s11, %s4732_s25, %s5347_s16, %s5347_s16, %s5346_s4  }
  0xdc   : > { %s4890_s1 = scalar_lea.hbm %s5284_s3, %s4711_s28  ;;  %s462_s13 = scalar_lea.vmem [#allocation8], %s4706_s20 }
  0xdd   : > { %s472_s26 = sshll.u32 %s462_s13, 4  ;;  %s5352_s12 = sand.u32 1, %s4489_s18   ;;  %s4893_s26 = int_to_ptr.vmem [resolvable:$true] %s472_s26 }
  0xde   : > { %s4897_s30 = scalar_lea.sflag [#allocation9], %s5352_s12  ;;  %s4357_s9 = scalar_lea.hbm %s4890_s1, 1280 }
  0xdf   : > { %p4358_p9 = scmp.ne.s32.totalorder %s4890_s1, %s4357_s9  ;;  %s4362_s28 = scalar_lea.hbm %s5284_s3, 2560 }
  0xe0   : > { %p4363_p12 = scmp.lt.u32.totalorder %s4890_s1, %s5284_s3  ;;  %p4364_p13 = scmp.lt.u32.totalorder %s4362_s28, %s4357_s9 }
  0xe1   : > { %p4360_p2 = pnand %p4358_p9, %p4738_p0  ;;  %p4366_p6 = scmp.lt.u32.totalorder %s4357_s9, %s4890_s1 }
  0xe2   : > { %p4365_p10 = por %p4364_p13, %p4363_p12 }
  0xe3   : > { %p4361_p8 = pneg %p4360_p2 }
  0xe4   : > { %p4367_p3 = por %p4366_p6, %p4365_p10 }
  0xe6   : > { %p4368_p7 = pnand %p4367_p3, %p4361_p8 }
  0xe8   : > { %4371 = shalt.err (!%p4368_p7)
}
  0xe9   : > { %s4372_s20 = scalar_lea.vmem %s4893_s26, 1280  ;;  %s4500_s19 = smov [#allocation8]  }
  0xea   : > { %p4373_p5 = scmp.ne.s32.totalorder %s4893_s26, %s4372_s20  ;;  %s4377_s27 = sshll.u32 %s4500_s19, 4  ;;  %s4378_s27 = int_to_ptr.vmem [resolvable:$false] %s4377_s27 }
  0xeb   : > { %s4379_s5 = scalar_lea.vmem %s4378_s27, 2560  ;;  %p4380_p9 = scmp.lt.s32.totalorder %s4893_s26, %s4378_s27 }
  0xec   : > { %p4375_p11 = pnand %p4373_p5, %p4738_p0  ;;  %p4381_p2 = scmp.lt.s32.totalorder %s4379_s5, %s4372_s20 }
  0xee   : > { %p4376_p4 = pneg %p4375_p11  ;;  %p4382_p12 = por %p4381_p2, %p4380_p9 }
  0xf0   : > { %p4383_p13 = pnand %p4382_p12, %p4376_p4 }
  0xf2   : > { %4386 = shalt.err (!%p4383_p13)
}
  0xf3   : > { %4083 = dma.hbm_to_vmem [thread:$0]  (!%p5351_p1), %s4890_s1, 1280, %s4893_s26, %s4897_s30, %s5347_s16, %s5347_s16, %s5346_s4  }
  0xf4   : > { %p5353_p0 = scmp.ne.s32.totalorder %s5335_s24, 0 }
  0xf5   : > { %s4927_s22 = sand.u32 (!%p5353_p0), 1, %s4473_s14   ;;  %p5354_p8 = scmp.ne.s32.totalorder (!%p5353_p0), %s5330_s21, 0 }
  0xf6   : > { %484 = sbr.rel (%p5353_p0) target bundleno = 1675 (0x68b), region = 60  ;;  %s487_s6 = scalar_lea.sflag (!%p5353_p0), [#allocation3], %s4927_s22 }
  0xf7   : > { %s4031_s10 = smul.u32 (!%p5353_p0), 80, %s4927_s22 }
  0xf9   : > { %s4931_s13 = scalar_lea.vmem (!%p5353_p0), [#allocation2], %s4031_s10 }
  0xfd   : > { %4440 = dma.done.wait (%p5354_p8), %s487_s6, 1280  }
  0xfe   : > { %4442 = vsyncadd (%p5354_p8), %s487_s6, 4294966016  ;;  %s5355_s29 = sld [smem:[#allocation27_spill]]  ;;  %s4938_s16 = scalar_lea.vmem [#allocation5], %s4031_s10 }
 0x104   : > { %s495_s4 = sand.u32 1, %s5355_s29  }
 0x105   : > { %s496_s24 = scalar_lea.sflag [#allocation6], %s495_s4 }
 0x106   : > { %4444 = dma.done.wait (%p5354_p8), %s496_s24, 2560  }
 0x107   : > { %4446 = vsyncadd (%p5354_p8), %s496_s24, 4294964736  ;;  %s4944_s1 = scalar_lea.vmem [#allocation7], %s4031_s10  ;;  %s514_s26 = scalar_lea.sflag [#allocation9], %s495_s4 }
 0x108   : > { %s4946_s12 = scalar_lea.vmem [#allocation8], %s4031_s10 }
 0x109   : > { %4448 = dma.done.wait (%p5354_p8), %s514_s26, 1280  }
 0x10a   : > { %4450 = vsyncadd (%p5354_p8), %s514_s26, 4294966016  ;;  %p5356_p1 = scmp.eq.s32.totalorder %s5355_s29, 0 }
 0x10c   : > { %4452 = dma.done.wait (%p5356_p1), [#allocation9], 256   ;;  %p5357_p10 = pmov %p5356_p1 }
 0x10d   : > { %p5358_p6 = pmov %p5356_p1 }
 0x10e   : > { %4454 = vsyncadd (%p5357_p10), [#allocation9], 4294967040 }
 0x10f   : > { %4456 = dma.done.wait (%p5358_p6), [#allocation12], 512   ;;  %p5359_p3 = pmov %p5356_p1 }
 0x110   : > { %p5360_p7 = pmov %p5356_p1 }
 0x111   : > { %4458 = vsyncadd (%p5359_p3), [#allocation12], 4294966784 }
 0x112   : > { %4460 = dma.done.wait (%p5360_p7), [#allocation15], 256   ;;  %p5361_p5 = pmov %p5356_p1 }
 0x113   : > { %vm593_vm0 = vcmask 130048   ;;  %v602_v0 = vld [vmem:[#allocation13] sm:$0xff]  ;;  %v603_v1 = vld [vmem:[#allocation13 + $0x8] sm:$0xff]  ;;  %v604_v2 = vld [vmem:[#allocation14] sm:$0xff]  ;;  %s5362_s9 = sld [smem:[#allocation36_spill]]  ;;  %s5363_s23 = sld [smem:[#allocation34_spill]] }
 0x114   : > { %4462 = vsyncadd (%p5361_p5), [#allocation15], 4294967040  ;;  %v4964_v3 = vpack.c.bf16 %v603_v1, %v602_v0  ;;  %v605_v4 = vld [vmem:[#allocation14 + $0x8] sm:$0xff]  ;;  %v610_v5 = vld [vmem:[%s4931_s13] sm:$0xff]  ;;  %s3454_s27 = sshll.u32 %s4927_s22, 5  ;;  %v4501_v44 = vmov 0.0  }
 0x115   : > { %v612_v6 = vld [vmem:[%s4938_s16] sm:$0xff]  ;;  %v4968_v7 = vpack.c.bf16 %v605_v4, %v604_v2  ;;  %3697 = vmatprep.mubr.msk.f32.mxu0 %vm593_vm0, %v610_v5  ;;  %v611_v10 = vld [vmem:[%s4931_s13 + $0x8] sm:$0xff]  ;;  %v3471_v37 = vld [vmem:[%s4931_s13 + $0x10] sm:$0xff]  ;;  %s5043_s5 = scalar_lea.vmem [#allocation16], %s3454_s27  ;;  %s5364_s10 = sld [smem:[#allocation25_spill]] }
 0x116   : > { %3704 = vmatprep.mubr.msk.f32.mxu1 %vm593_vm0, %v612_v6  ;;  %3904 = vmatprep.subr.bf16.mxu0 %v4964_v3  ;;  %v777_v12 = vadd.f32 %v612_v6, %v610_v5  ;;  %v613_v13 = vld [vmem:[%s4938_s16 + $0x8] sm:$0xff]  ;;  %v4992_v15 = vld [vmem:[#allocation10] sm:$0xff]  ;;  %v5005_v32 = vld [vmem:[#allocation11] sm:$0xff]  ;;  %595 = vst.msk [vmem:[%s5043_s5 + $0x8] sm:$0xff] %vm593_vm0, %v4501_v44  ;;  %s5365_s29 = sld [smem:[#allocation28_spill]]  ;;  %s4502_s30 = smov [#allocation16]  }
 0x117   : > { %3908 = vmatprep.subr.bf16.mxu1 %v4968_v7  ;;  %3906 = vmatpush3.bf16.msra.mxu0 %v4964_v3  ;;  %v778_v14 = vadd.f32 %v613_v13, %v611_v10  ;;  %v5003_v30 = vld [vmem:[#allocation10 + $0x8] sm:$0xff]  ;;  %v3473_v38 = vld [vmem:[%s4938_s16 + $0x10] sm:$0xff]  ;;  %v5019_v39 = vld [vmem:[#allocation11 + $0x8] sm:$0xff]  ;;  %597 = vst.msk [vmem:[%s5043_s5 + $0x18] sm:$0xff] %vm593_vm0, %v4501_v44  ;;  %s4391_s25 = sshll.u32 %s4502_s30, 4  ;;  %s4392_s25 = int_to_ptr.vmem [resolvable:$false] %s4391_s25 }
 0x118   : > { %3910 = vmatpush3.bf16.msra.mxu1 %v4968_v7  ;;  %v3472_v40 = vld [vmem:[%s4931_s13 + $0x18] sm:$0xff]  ;;  %v1314_v41 = vadd.f32 %v3473_v38, %v3471_v37  ;;  %594 = vst.msk [vmem:[%s5043_s5] sm:$0xff] %vm593_vm0, %v4501_v44  ;;  %596 = vst.msk [vmem:[%s5043_s5 + $0x10] sm:$0xff] %vm593_vm0, %v4501_v44  ;;  %v1118_v52 = vld [vmem:[%s4944_s1 + $0x8] sm:$0xff]  ;;  %s4393_s17 = scalar_lea.vmem %s4392_s25, 1024 }
 0x119   : > { %v608_v8 = vld [vmem:[%s5362_s9] sm:$0xff]  ;;  %v609_v9 = vld [vmem:[%s5362_s9 + $0x8] sm:$0xff] }
 0x11a   : > { %v4982_v11 = vpack.c.bf16 %v609_v9, %v608_v8  ;;  %3698 = vmatmul.mubr.msk.f32.vlgmr.msra.gmra.mrb[0].mxu0 %vm593_vm0, %v611_v10  ;;  %v4999_v16 = vld [vmem:[%s5363_s23] sm:$0xff]  ;;  %v5014_v36 = vld [vmem:[%s5363_s23 + $0x8] sm:$0xff] }
 0x11b   : > { %3705 = vmatmul.mubr.msk.f32.vlgmr.msra.gmra.mrb[0].mxu1 %vm593_vm0, %v613_v13  ;;  %3711 = vmatprep.mubr.msk.f32.mxu0 %vm593_vm0, %v777_v12  ;;  %v3474_v42 = vld [vmem:[%s4938_s16 + $0x18] sm:$0xff]  ;;  %v1120_v53 = vld [vmem:[%s4946_s12 + $0x8] sm:$0xff]  ;;  %v1117_v56 = vld [vmem:[%s4944_s1] sm:$0xff]  ;;  %s3572_s6 = sshll.u32 %s5364_s10, 9 }
 0x11c   : > { %3912 = vmatprep.subr.bf16.mxu0 %v4982_v11  ;;  %3718 = vmatprep.mubr.msk.f32.mxu1 %vm593_vm0, %v4992_v15  ;;  %v1315_v43 = vadd.f32 %v3474_v42, %v3472_v40  ;;  %v1119_v59 = vld [vmem:[%s4946_s12] sm:$0xff]  ;;  %p5368_p4 = scmp.ne.s32.totalorder %s5365_s29, 0 }
 0x11d   : > { %3914 = vmatpush3.bf16.msra.mxu0 %v4982_v11  ;;  %v1122_v10 = vld [vmem:[%s5043_s5 + $0x8] sm:$0xff]  ;;  %v3497_v44 = vld [vmem:[%s4938_s16 + $0x20] sm:$0xff] }
 0x11e   : > { %v3468_v12 = vld [vmem:[%s5043_s5 + $0x18] sm:$0xff] }
 0x120   : > { %3712 = vmatmul.mubr.msk.f32.vlgmr.msra.gmra.mrb[2].mxu0 %vm593_vm0, %v778_v14 }
 0x121   : > { %3725 = vmatprep.mubr.msk.f32.mxu0 %vm593_vm0, %v4999_v16 }
 0x1ed   : > { %v3699_v17 = vpop.f32.mrb[0].mxu0 }
 0x1ee   : > { %v3706_v18 = vpop.f32.mrb[0].mxu1  ;;  %v687_v19 = vpop.f32.mrb[1].mxu0 }
 0x1ef   : > { %v861_v20 = vsub.f32 %v3699_v17, %v3706_v18  ;;  %v768_v21 = vpop.f32.mrb[1].mxu1 }
 0x1f0   : > { %v860_v22 = vsub.f32 %v687_v19, %v768_v21 }
 0x1f2   : > { %v3915_v24 = vpack.c.bf16 %v861_v20, %v860_v22 }
 0x1f3   : > { %v3713_v23 = vpop.f32.mrb[2].mxu0 }
 0x1f4   : > { %v863_v25 = vsub.f32 %v3713_v23, %v3699_v17  ;;  %v851_v26 = vpop.f32.mrb[3].mxu0  ;;  %3916 = vmatprep.subr.bf16.mxu1 %v3915_v24 }
 0x1f5   : > { %v862_v27 = vsub.f32 %v851_v26, %v687_v19  ;;  %3918 = vmatpush3.bf16.msra.mxu1 %v3915_v24 }
 0x1f6   : > { %v865_v28 = vsub.f32 %v863_v25, %v3706_v18 }
 0x1f7   : > { %v864_v29 = vsub.f32 %v862_v27, %v768_v21  ;;  %v1121_v21 = vld [vmem:[%s5043_s5] sm:$0xff] }
 0x1f8   : > { %v1029_v31 = vadd.f32 %v865_v28, %v861_v20  ;;  %3719 = vmatmul.mubr.msk.f32.vlgmr.msra.gmra.mrb[2].mxu1 %vm593_vm0, %v5003_v30 }
 0x1f9   : > { %v1028_v33 = vadd.f32 %v864_v29, %v860_v22  ;;  %v3919_v34 = vpack.c.bf16 %v865_v28, %v864_v29  ;;  %3732 = vmatprep.mubr.msk.f32.mxu1 %vm593_vm0, %v5005_v32  ;;  %v3467_v22 = vld [vmem:[%s5043_s5 + $0x10] sm:$0xff] }
 0x1fb   : > { %3920 = vmatprep.subr.bf16.mxu0 %v3919_v34  ;;  %v3923_v35 = vpack.c.bf16 %v1029_v31, %v1028_v33 }
 0x1fc   : > { %3922 = vmatpush3.bf16.msra.mxu0 %v3919_v34 }
 0x1fd   : > { %3924 = vmatprep.subr.bf16.mxu1 %v3923_v35  ;;  %3928 = vmatprep.subr.bf16.mxu0 %v4964_v3 }
 0x1fe   : > { %3926 = vmatpush3.bf16.msra.mxu1 %v3923_v35 }
 0x1ff   : > { %3726 = vmatmul.mubr.msk.f32.vlgmr.msra.gmra.mrb[4].mxu0 %vm593_vm0, %v5014_v36  ;;  %3932 = vmatprep.subr.bf16.mxu1 %v4968_v7 }
 0x200   : > { %3930 = vmatpush3.bf16.msra.mxu0 %v4964_v3  ;;  %3739 = vmatprep.mubr.msk.f32.mxu0 %vm593_vm0, %v3471_v37 }
 0x201   : > { %3733 = vmatmul.mubr.msk.f32.vlgmr.msra.gmra.mrb[4].mxu1 %vm593_vm0, %v5019_v39  ;;  %3936 = vmatprep.subr.bf16.mxu0 %v4982_v11 }
 0x202   : > { %3934 = vmatpush3.bf16.msra.mxu1 %v4968_v7  ;;  %3746 = vmatprep.mubr.msk.f32.mxu1 %vm593_vm0, %v3473_v38 }
 0x203   : > { %3740 = vmatmul.mubr.msk.f32.vlgmr.msra.gmra.mrb[6].mxu0 %vm593_vm0, %v3472_v40 }
 0x204   : > { %3938 = vmatpush3.bf16.msra.mxu0 %v4982_v11  ;;  %3753 = vmatprep.mubr.msk.f32.mxu0 %vm593_vm0, %v1314_v41 }
 0x205   : > { %3747 = vmatmul.mubr.msk.f32.vlgmr.msra.gmra.mrb[6].mxu1 %vm593_vm0, %v3474_v42 }
 0x206   : > { %3760 = vmatprep.mubr.msk.f32.mxu1 %vm593_vm0, %v4992_v15 }
 0x207   : > { %3754 = vmatmul.mubr.msk.f32.vlgmr.msra.gmra.mrb[8].mxu0 %vm593_vm0, %v1315_v43  ;;  %v3495_v43 = vld [vmem:[%s4931_s13 + $0x20] sm:$0xff] }
 0x208   : > { %3767 = vmatprep.mubr.msk.f32.mxu0 %vm593_vm0, %v4999_v16 }
 0x2cb   : > { %v3720_v45 = vpop.f32.mrb[2].mxu1 }
 0x2cc   : > { %v938_v46 = vpop.f32.mrb[3].mxu1 }
 0x2d2   : > { %v3727_v47 = vpop.f32.mrb[4].mxu0 }
 0x2d3   : > { %v1112_v48 = vsub.f32 %v3720_v45, %v3727_v47  ;;  %v1019_v49 = vpop.f32.mrb[5].mxu0 }
 0x2d4   : > { %v1111_v50 = vsub.f32 %v938_v46, %v1019_v49  ;;  %v3734_v51 = vpop.f32.mrb[4].mxu1 }
 0x2d5   : > { %v1114_v54 = vsub.f32 %v3734_v51, %v3720_v45  ;;  %v1102_v55 = vpop.f32.mrb[5].mxu1  ;;  %v1124_v62 = vmul.f32 %v1118_v52, %v1112_v48  ;;  %v1139_v63 = vmul.f32 %v1120_v53, %v1112_v48  ;;  %v3496_v45 = vld [vmem:[%s4931_s13 + $0x28] sm:$0xff] }
 0x2d6   : > { %v1113_v57 = vsub.f32 %v1102_v55, %v938_v46  ;;  %v3741_v58 = vpop.f32.mrb[6].mxu0  ;;  %v1123_v2 = vmul.f32 %v1117_v56, %v1111_v50  ;;  %v1138_v9 = vmul.f32 %v1119_v59, %v1111_v50  ;;  %v1834_v46 = vadd.f32 %v3497_v44, %v3495_v43 }
 0x2d7   : > { %v1116_v60 = vsub.f32 %v1114_v54, %v3727_v47  ;;  %v1224_v61 = vpop.f32.mrb[7].mxu0  ;;  %v3498_v47 = vld [vmem:[%s4938_s16 + $0x28] sm:$0xff] }
 0x2d8   : > { %v1115_v0 = vsub.f32 %v1113_v57, %v1019_v49  ;;  %v3748_v1 = vpop.f32.mrb[6].mxu1  ;;  %v1835_v48 = vadd.f32 %v3498_v47, %v3496_v45  ;;  %v3490_v57 = vld [vmem:[%s4946_s12 + $0x18] sm:$0xff] }
 0x2d9   : > { %v1126_v4 = vmul.f32 %v1120_v53, %v1116_v60  ;;  %v1137_v5 = vmul.f32 %v1118_v52, %v1116_v60  ;;  %v1398_v6 = vsub.f32 %v3741_v58, %v3748_v1  ;;  %v1305_v8 = vpop.f32.mrb[7].mxu1  ;;  %v3487_v60 = vld [vmem:[%s4944_s1 + $0x10] sm:$0xff] }
 0x2da   : > { %v1125_v13 = vmul.f32 %v1119_v59, %v1115_v0  ;;  %v1136_v14 = vmul.f32 %v1117_v56, %v1115_v0  ;;  %v1397_v17 = vsub.f32 %v1224_v61, %v1305_v8  ;;  %v3755_v18 = vpop.f32.mrb[8].mxu0  ;;  %v3488_v56 = vld [vmem:[%s4944_s1 + $0x18] sm:$0xff] }
 0x2db   : > { %v1128_v19 = vadd.f32 %v1126_v4, %v1124_v62  ;;  %v1141_v20 = vsub.f32 %v1137_v5, %v1139_v63  ;;  %v1400_v23 = vsub.f32 %v3755_v18, %v3741_v58  ;;  %v1388_v24 = vpop.f32.mrb[9].mxu0  ;;  %v3489_v63 = vld [vmem:[%s4946_s12 + $0x10] sm:$0xff] }
 0x2dc   : > { %v1127_v25 = vadd.f32 %v1125_v13, %v1123_v2  ;;  %v1140_v26 = vsub.f32 %v1136_v14, %v1138_v9  ;;  %v3939_v27 = vpack.c.bf16 %v1398_v6, %v1397_v17  ;;  %v1399_v28 = vsub.f32 %v1388_v24, %v1224_v61 }
 0x2dd   : > { %v1130_v29 = vadd.f32 %v1128_v19, %v1122_v10  ;;  %v1143_v31 = vadd.f32 %v3468_v12, %v1141_v20  ;;  %v1402_v33 = vsub.f32 %v1400_v23, %v3748_v1 }
 0x2de   : > { %v1129_v34 = vadd.f32 %v1127_v25, %v1121_v21  ;;  %v1142_v35 = vadd.f32 %v3467_v22, %v1140_v26  ;;  %v1401_v37 = vsub.f32 %v1399_v28, %v1305_v8  ;;  %3940 = vmatprep.subr.bf16.mxu1 %v3939_v27 }
 0x2df   : > { %1132 = vst.msk [vmem:[%s5043_s5 + $0x8] sm:$0xff] %vm593_vm0, %v1130_v29  ;;  %3470 = vst.msk [vmem:[%s5043_s5 + $0x18] sm:$0xff] %vm593_vm0, %v1143_v31  ;;  %v1554_v38 = vadd.f32 %v1402_v33, %v1398_v6  ;;  %3942 = vmatpush3.bf16.msra.mxu1 %v3939_v27 }
 0x2e0   : > { %1131 = vst.msk [vmem:[%s5043_s5] sm:$0xff] %vm593_vm0, %v1129_v34  ;;  %3469 = vst.msk [vmem:[%s5043_s5 + $0x10] sm:$0xff] %vm593_vm0, %v1142_v35  ;;  %v1553_v40 = vadd.f32 %v1401_v37, %v1397_v17  ;;  %v3943_v41 = vpack.c.bf16 %v1402_v33, %v1401_v37 }
 0x2e2   : > { %3944 = vmatprep.subr.bf16.mxu0 %v3943_v41  ;;  %3761 = vmatmul.mubr.msk.f32.vlgmr.msra.gmra.mrb[8].mxu1 %vm593_vm0, %v5003_v30  ;;  %v3947_v42 = vpack.c.bf16 %v1554_v38, %v1553_v40 }
 0x2e3   : > { %3946 = vmatpush3.bf16.msra.mxu0 %v3943_v41  ;;  %3774 = vmatprep.mubr.msk.f32.mxu1 %vm593_vm0, %v5005_v32 }
 0x2e4   : > { %3948 = vmatprep.subr.bf16.mxu1 %v3947_v42  ;;  %3952 = vmatprep.subr.bf16.mxu0 %v4964_v3 }
 0x2e5   : > { %3950 = vmatpush3.bf16.msra.mxu1 %v3947_v42 }
 0x2e6   : > { %3768 = vmatmul.mubr.msk.f32.vlgmr.msra.gmra.mrb[10].mxu0 %vm593_vm0, %v5014_v36  ;;  %3956 = vmatprep.subr.bf16.mxu1 %v4968_v7  ;;  %v1643_v25 = vld [vmem:[%s5043_s5 + $0x8] sm:$0xff]  ;;  %v3492_v26 = vld [vmem:[%s5043_s5 + $0x18] sm:$0xff] }
 0x2e7   : > { %3954 = vmatpush3.bf16.msra.mxu0 %v4964_v3  ;;  %3781 = vmatprep.mubr.msk.f32.mxu0 %vm593_vm0, %v3495_v43  ;;  %v1642_v35 = vld [vmem:[%s5043_s5] sm:$0xff]  ;;  %v3491_v37 = vld [vmem:[%s5043_s5 + $0x10] sm:$0xff] }
 0x2e8   : > { %3775 = vmatmul.mubr.msk.f32.vlgmr.msra.gmra.mrb[10].mxu1 %vm593_vm0, %v5019_v39  ;;  %3960 = vmatprep.subr.bf16.mxu0 %v4982_v11 }
 0x2e9   : > { %3958 = vmatpush3.bf16.msra.mxu1 %v4968_v7  ;;  %3788 = vmatprep.mubr.msk.f32.mxu1 %vm593_vm0, %v3497_v44 }
 0x2ea   : > { %3782 = vmatmul.mubr.msk.f32.vlgmr.msra.gmra.mrb[12].mxu0 %vm593_vm0, %v3496_v45 }
 0x2eb   : > { %3962 = vmatpush3.bf16.msra.mxu0 %v4982_v11  ;;  %3795 = vmatprep.mubr.msk.f32.mxu0 %vm593_vm0, %v1834_v46 }
 0x2ec   : > { %3789 = vmatmul.mubr.msk.f32.vlgmr.msra.gmra.mrb[12].mxu1 %vm593_vm0, %v3498_v47  ;;  %v3519_v47 = vld [vmem:[%s4931_s13 + $0x30] sm:$0xff] }
 0x2ed   : > { %3802 = vmatprep.mubr.msk.f32.mxu1 %vm593_vm0, %v4992_v15 }
 0x2ee   : > { %3796 = vmatmul.mubr.msk.f32.vlgmr.msra.gmra.mrb[14].mxu0 %vm593_vm0, %v1835_v48  ;;  %v3521_v48 = vld [vmem:[%s4938_s16 + $0x30] sm:$0xff] }
 0x2ef   : > { %3809 = vmatprep.mubr.msk.f32.mxu0 %vm593_vm0, %v4999_v16 }
 0x3b5   : > { %v3762_v49 = vpop.f32.mrb[8].mxu1 }
 0x3b6   : > { %v1469_v50 = vpop.f32.mrb[9].mxu1 }
 0x3b9   : > { %v3769_v51 = vpop.f32.mrb[10].mxu0 }
 0x3ba   : > { %v1631_v52 = vsub.f32 %v3762_v49, %v3769_v51  ;;  %v1544_v53 = vpop.f32.mrb[11].mxu0 }
 0x3bb   : > { %v1630_v54 = vsub.f32 %v1469_v50, %v1544_v53  ;;  %v3776_v55 = vpop.f32.mrb[10].mxu1 }
 0x3bc   : > { %v1633_v58 = vsub.f32 %v3776_v55, %v3762_v49  ;;  %v1621_v59 = vpop.f32.mrb[11].mxu1  ;;  %v1645_v2 = vmul.f32 %v3488_v56, %v1631_v52  ;;  %v1659_v4 = vmul.f32 %v3490_v57, %v1631_v52  ;;  %v3520_v49 = vld [vmem:[%s4931_s13 + $0x38] sm:$0xff] }
 0x3bd   : > { %v1632_v61 = vsub.f32 %v1621_v59, %v1469_v50  ;;  %v3783_v62 = vpop.f32.mrb[12].mxu0  ;;  %v1644_v8 = vmul.f32 %v3487_v60, %v1630_v54  ;;  %v1658_v14 = vmul.f32 %v3489_v63, %v1630_v54  ;;  %v2354_v50 = vadd.f32 %v3521_v48, %v3519_v47 }
 0x3be   : > { %v1635_v0 = vsub.f32 %v1633_v58, %v3769_v51  ;;  %v1744_v1 = vpop.f32.mrb[13].mxu0  ;;  %v3522_v51 = vld [vmem:[%s4938_s16 + $0x38] sm:$0xff] }
 0x3bf   : > { %v1634_v5 = vsub.f32 %v1632_v61, %v1544_v53  ;;  %v3790_v6 = vpop.f32.mrb[12].mxu1  ;;  %v2355_v52 = vadd.f32 %v3522_v51, %v3520_v49  ;;  %v3514_v61 = vld [vmem:[%s4946_s12 + $0x28] sm:$0xff] }
 0x3c0   : > { %v1647_v9 = vmul.f32 %v3490_v57, %v1635_v0  ;;  %v1657_v10 = vmul.f32 %v3488_v56, %v1635_v0  ;;  %v1918_v12 = vsub.f32 %v3783_v62, %v3790_v6  ;;  %v1825_v13 = vpop.f32.mrb[13].mxu1  ;;  %v3511_v0 = vld [vmem:[%s4944_s1 + $0x20] sm:$0xff] }
 0x3c1   : > { %v1646_v17 = vmul.f32 %v3489_v63, %v1634_v5  ;;  %v1656_v18 = vmul.f32 %v3487_v60, %v1634_v5  ;;  %v1917_v19 = vsub.f32 %v1744_v1, %v1825_v13  ;;  %v3797_v20 = vpop.f32.mrb[14].mxu0  ;;  %v3512_v60 = vld [vmem:[%s4944_s1 + $0x28] sm:$0xff] }
 0x3c2   : > { %v1649_v21 = vadd.f32 %v1647_v9, %v1645_v2  ;;  %v1661_v22 = vsub.f32 %v1657_v10, %v1659_v4  ;;  %v1920_v23 = vsub.f32 %v3797_v20, %v3783_v62  ;;  %v1908_v24 = vpop.f32.mrb[15].mxu0  ;;  %v3513_v4 = vld [vmem:[%s4946_s12 + $0x20] sm:$0xff] }
 0x3c3   : > { %v1648_v27 = vadd.f32 %v1646_v17, %v1644_v8  ;;  %v1660_v28 = vsub.f32 %v1656_v18, %v1658_v14  ;;  %v3963_v29 = vpack.c.bf16 %v1918_v12, %v1917_v19  ;;  %v1919_v31 = vsub.f32 %v1908_v24, %v1744_v1 }
 0x3c4   : > { %v1651_v33 = vadd.f32 %v1649_v21, %v1643_v25  ;;  %v1663_v34 = vadd.f32 %v3492_v26, %v1661_v22  ;;  %v1922_v38 = vsub.f32 %v1920_v23, %v3790_v6 }
 0x3c5   : > { %v1650_v40 = vadd.f32 %v1648_v27, %v1642_v35  ;;  %v1662_v41 = vadd.f32 %v3491_v37, %v1660_v28  ;;  %v1921_v42 = vsub.f32 %v1919_v31, %v1825_v13  ;;  %3964 = vmatprep.subr.bf16.mxu1 %v3963_v29 }
 0x3c6   : > { %1653 = vst.msk [vmem:[%s5043_s5 + $0x8] sm:$0xff] %vm593_vm0, %v1651_v33  ;;  %3494 = vst.msk [vmem:[%s5043_s5 + $0x18] sm:$0xff] %vm593_vm0, %v1663_v34  ;;  %v2074_v43 = vadd.f32 %v1922_v38, %v1918_v12  ;;  %3966 = vmatpush3.bf16.msra.mxu1 %v3963_v29 }
 0x3c7   : > { %1652 = vst.msk [vmem:[%s5043_s5] sm:$0xff] %vm593_vm0, %v1650_v40  ;;  %3493 = vst.msk [vmem:[%s5043_s5 + $0x10] sm:$0xff] %vm593_vm0, %v1662_v41  ;;  %v2073_v44 = vadd.f32 %v1921_v42, %v1917_v19  ;;  %v3967_v45 = vpack.c.bf16 %v1922_v38, %v1921_v42 }
 0x3c9   : > { %3968 = vmatprep.subr.bf16.mxu0 %v3967_v45  ;;  %3803 = vmatmul.mubr.msk.f32.vlgmr.msra.gmra.mrb[14].mxu1 %vm593_vm0, %v5003_v30  ;;  %v3971_v46 = vpack.c.bf16 %v2074_v43, %v2073_v44 }
 0x3ca   : > { %3970 = vmatpush3.bf16.msra.mxu0 %v3967_v45  ;;  %3816 = vmatprep.mubr.msk.f32.mxu1 %vm593_vm0, %v5005_v32 }
 0x3cb   : > { %3972 = vmatprep.subr.bf16.mxu1 %v3971_v46  ;;  %3976 = vmatprep.subr.bf16.mxu0 %v4964_v3 }
 0x3cc   : > { %3974 = vmatpush3.bf16.msra.mxu1 %v3971_v46 }
 0x3cd   : > { %3810 = vmatmul.mubr.msk.f32.vlgmr.msra.gmra.mrb[16].mxu0 %vm593_vm0, %v5014_v36  ;;  %3980 = vmatprep.subr.bf16.mxu1 %v4968_v7  ;;  %v2163_v29 = vld [vmem:[%s5043_s5 + $0x8] sm:$0xff]  ;;  %v3516_v31 = vld [vmem:[%s5043_s5 + $0x18] sm:$0xff] }
 0x3ce   : > { %3978 = vmatpush3.bf16.msra.mxu0 %v4964_v3  ;;  %3823 = vmatprep.mubr.msk.f32.mxu0 %vm593_vm0, %v3519_v47  ;;  %v2162_v41 = vld [vmem:[%s5043_s5] sm:$0xff]  ;;  %v3515_v42 = vld [vmem:[%s5043_s5 + $0x10] sm:$0xff] }
 0x3cf   : > { %3817 = vmatmul.mubr.msk.f32.vlgmr.msra.gmra.mrb[16].mxu1 %vm593_vm0, %v5019_v39  ;;  %3984 = vmatprep.subr.bf16.mxu0 %v4982_v11 }
 0x3d0   : > { %3982 = vmatpush3.bf16.msra.mxu1 %v4968_v7  ;;  %3830 = vmatprep.mubr.msk.f32.mxu1 %vm593_vm0, %v3521_v48 }
 0x3d1   : > { %3824 = vmatmul.mubr.msk.f32.vlgmr.msra.gmra.mrb[18].mxu0 %vm593_vm0, %v3520_v49 }
 0x3d2   : > { %3986 = vmatpush3.bf16.msra.mxu0 %v4982_v11  ;;  %3837 = vmatprep.mubr.msk.f32.mxu0 %vm593_vm0, %v2354_v50 }
 0x3d3   : > { %3831 = vmatmul.mubr.msk.f32.vlgmr.msra.gmra.mrb[18].mxu1 %vm593_vm0, %v3522_v51  ;;  %v3543_v51 = vld [vmem:[%s4931_s13 + $0x40] sm:$0xff] }
 0x3d4   : > { %3844 = vmatprep.mubr.msk.f32.mxu1 %vm593_vm0, %v4992_v15 }
 0x3d5   : > { %3838 = vmatmul.mubr.msk.f32.vlgmr.msra.gmra.mrb[20].mxu0 %vm593_vm0, %v2355_v52  ;;  %v3545_v52 = vld [vmem:[%s4938_s16 + $0x40] sm:$0xff] }
 0x3d6   : > { %3851 = vmatprep.mubr.msk.f32.mxu0 %vm593_vm0, %v4999_v16 }
 0x49c   : > { %v3804_v53 = vpop.f32.mrb[14].mxu1 }
 0x49d   : > { %v1989_v54 = vpop.f32.mrb[15].mxu1 }
 0x4a0   : > { %v3811_v55 = vpop.f32.mrb[16].mxu0 }
 0x4a1   : > { %v2151_v56 = vsub.f32 %v3804_v53, %v3811_v55  ;;  %v2064_v57 = vpop.f32.mrb[17].mxu0 }
 0x4a2   : > { %v2150_v58 = vsub.f32 %v1989_v54, %v2064_v57  ;;  %v3818_v59 = vpop.f32.mrb[16].mxu1 }
 0x4a3   : > { %v2153_v62 = vsub.f32 %v3818_v59, %v3804_v53  ;;  %v2141_v63 = vpop.f32.mrb[17].mxu1  ;;  %v2165_v8 = vmul.f32 %v3512_v60, %v2151_v56  ;;  %v2179_v9 = vmul.f32 %v3514_v61, %v2151_v56  ;;  %v3544_v53 = vld [vmem:[%s4931_s13 + $0x48] sm:$0xff]  ;;  %s3240_s13 = sshll.u32 %s5043_s5, 4  ;;  %s5224_s13 = int_to_ptr.vmem [resolvable:$true] %s3240_s13 }
 0x4a4   : > { %v2152_v1 = vsub.f32 %v2141_v63, %v1989_v54  ;;  %v3825_v2 = vpop.f32.mrb[18].mxu0  ;;  %v2164_v13 = vmul.f32 %v3511_v0, %v2150_v58  ;;  %v2178_v20 = vmul.f32 %v3513_v4, %v2150_v58  ;;  %v2874_v54 = vadd.f32 %v3545_v52, %v3543_v51  ;;  %s4387_s21 = scalar_lea.vmem %s5224_s13, 512  ;;  %p4394_p12 = scmp.lt.s32.totalorder %s5224_s13, %s4392_s25 }
 0x4a5   : > { %v2155_v5 = vsub.f32 %v2153_v62, %v3811_v55  ;;  %v2264_v6 = vpop.f32.mrb[19].mxu0  ;;  %v3546_v55 = vld [vmem:[%s4938_s16 + $0x48] sm:$0xff]  ;;  %v3538_v62 = vld [vmem:[%s4946_s12 + $0x38] sm:$0xff]  ;;  %s5366_s16 = sld [smem:[#allocation37_spill]]  ;;  %p4388_p11 = scmp.ne.s32.totalorder %s5224_s13, %s4387_s21 }
 0x4a6   : > { %v2154_v10 = vsub.f32 %v2152_v1, %v2064_v57  ;;  %v3832_v12 = vpop.f32.mrb[18].mxu1  ;;  %v2875_v56 = vadd.f32 %v3546_v55, %v3544_v53  ;;  %v3535_v1 = vld [vmem:[%s4944_s1 + $0x30] sm:$0xff]  ;;  %p4395_p13 = scmp.lt.s32.totalorder %s4393_s17, %s4387_s21 }
 0x4a7   : > { %v2167_v14 = vmul.f32 %v3514_v61, %v2155_v5  ;;  %v2177_v17 = vmul.f32 %v3512_v60, %v2155_v5  ;;  %v2438_v18 = vsub.f32 %v3825_v2, %v3832_v12  ;;  %v2345_v19 = vpop.f32.mrb[19].mxu1  ;;  %v3536_v61 = vld [vmem:[%s4944_s1 + $0x38] sm:$0xff]  ;;  %p4389_p9 = pnand %p4388_p11, %p5368_p4 }
 0x4a8   : > { %v2166_v21 = vmul.f32 %v3513_v4, %v2154_v10  ;;  %v2176_v22 = vmul.f32 %v3511_v0, %v2154_v10  ;;  %v2437_v23 = vsub.f32 %v2264_v6, %v2345_v19  ;;  %v3839_v24 = vpop.f32.mrb[20].mxu0  ;;  %v3537_v4 = vld [vmem:[%s4946_s12 + $0x30] sm:$0xff]  ;;  %p4396_p0 = por %p4395_p13, %p4394_p12 }
 0x4a9   : > { %v2169_v25 = vadd.f32 %v2167_v14, %v2165_v8  ;;  %v2181_v26 = vsub.f32 %v2177_v17, %v2179_v9  ;;  %v2440_v27 = vsub.f32 %v3839_v24, %v3825_v2  ;;  %v2428_v28 = vpop.f32.mrb[21].mxu0  ;;  %p4390_p2 = pneg %p4389_p9 }
 0x4aa   : > { %v2168_v33 = vadd.f32 %v2166_v21, %v2164_v13  ;;  %v2180_v34 = vsub.f32 %v2176_v22, %v2178_v20  ;;  %v3987_v35 = vpack.c.bf16 %v2438_v18, %v2437_v23  ;;  %v2439_v37 = vsub.f32 %v2428_v28, %v2264_v6 }
 0x4ab   : > { %v2171_v38 = vadd.f32 %v2169_v25, %v2163_v29  ;;  %v2183_v40 = vadd.f32 %v3516_v31, %v2181_v26  ;;  %v2442_v43 = vsub.f32 %v2440_v27, %v3832_v12  ;;  %s5222_s26 = scalar_lea.hbm %s5366_s16, %s3572_s6  ;;  %p4397_p8 = pnand %p4396_p0, %p4390_p2 }
 0x4ac   : > { %v2170_v44 = vadd.f32 %v2168_v33, %v2162_v41  ;;  %v2182_v45 = vadd.f32 %v3515_v42, %v2180_v34  ;;  %v2441_v46 = vsub.f32 %v2439_v37, %v2345_v19  ;;  %3988 = vmatprep.subr.bf16.mxu1 %v3987_v35 }
 0x4ad   : > { %2173 = vst.msk [vmem:[%s5043_s5 + $0x8] sm:$0xff] %vm593_vm0, %v2171_v38  ;;  %3518 = vst.msk [vmem:[%s5043_s5 + $0x18] sm:$0xff] %vm593_vm0, %v2183_v40  ;;  %v2594_v47 = vadd.f32 %v2442_v43, %v2438_v18  ;;  %3990 = vmatpush3.bf16.msra.mxu1 %v3987_v35 }
 0x4ae   : > { %2172 = vst.msk [vmem:[%s5043_s5] sm:$0xff] %vm593_vm0, %v2170_v44  ;;  %3517 = vst.msk [vmem:[%s5043_s5 + $0x10] sm:$0xff] %vm593_vm0, %v2182_v45  ;;  %v2593_v48 = vadd.f32 %v2441_v46, %v2437_v23  ;;  %v3991_v49 = vpack.c.bf16 %v2442_v43, %v2441_v46 }
 0x4b0   : > { %3992 = vmatprep.subr.bf16.mxu0 %v3991_v49  ;;  %3845 = vmatmul.mubr.msk.f32.vlgmr.msra.gmra.mrb[20].mxu1 %vm593_vm0, %v5003_v30  ;;  %v3995_v50 = vpack.c.bf16 %v2594_v47, %v2593_v48 }
 0x4b1   : > { %3994 = vmatpush3.bf16.msra.mxu0 %v3991_v49  ;;  %3858 = vmatprep.mubr.msk.f32.mxu1 %vm593_vm0, %v5005_v32 }
 0x4b2   : > { %3996 = vmatprep.subr.bf16.mxu1 %v3995_v50  ;;  %4000 = vmatprep.subr.bf16.mxu0 %v4964_v3 }
 0x4b3   : > { %3998 = vmatpush3.bf16.msra.mxu1 %v3995_v50 }
 0x4b4   : > { %3852 = vmatmul.mubr.msk.f32.vlgmr.msra.gmra.mrb[22].mxu0 %vm593_vm0, %v5014_v36  ;;  %4004 = vmatprep.subr.bf16.mxu1 %v4968_v7  ;;  %v2683_v28 = vld [vmem:[%s5043_s5 + $0x8] sm:$0xff]  ;;  %v3540_v29 = vld [vmem:[%s5043_s5 + $0x18] sm:$0xff] }
 0x4b5   : > { %4002 = vmatpush3.bf16.msra.mxu0 %v4964_v3  ;;  %3865 = vmatprep.mubr.msk.f32.mxu0 %vm593_vm0, %v3543_v51  ;;  %v2682_v40 = vld [vmem:[%s5043_s5] sm:$0xff]  ;;  %v3539_v41 = vld [vmem:[%s5043_s5 + $0x10] sm:$0xff] }
 0x4b6   : > { %3859 = vmatmul.mubr.msk.f32.vlgmr.msra.gmra.mrb[22].mxu1 %vm593_vm0, %v5019_v39  ;;  %4008 = vmatprep.subr.bf16.mxu0 %v4982_v11 }
 0x4b7   : > { %4006 = vmatpush3.bf16.msra.mxu1 %v4968_v7  ;;  %3872 = vmatprep.mubr.msk.f32.mxu1 %vm593_vm0, %v3545_v52 }
 0x4b8   : > { %3866 = vmatmul.mubr.msk.f32.vlgmr.msra.gmra.mrb[24].mxu0 %vm593_vm0, %v3544_v53 }
 0x4b9   : > { %4010 = vmatpush3.bf16.msra.mxu0 %v4982_v11  ;;  %3879 = vmatprep.mubr.msk.f32.mxu0 %vm593_vm0, %v2874_v54 }
 0x4ba   : > { %3873 = vmatmul.mubr.msk.f32.vlgmr.msra.gmra.mrb[24].mxu1 %vm593_vm0, %v3546_v55 }
 0x4bb   : > { %3886 = vmatprep.mubr.msk.f32.mxu1 %vm593_vm0, %v4992_v15 }
 0x4bc   : > { %3880 = vmatmul.mubr.msk.f32.vlgmr.msra.gmra.mrb[26].mxu0 %vm593_vm0, %v2875_v56 }
 0x4bd   : > { %3893 = vmatprep.mubr.msk.f32.mxu0 %vm593_vm0, %v4999_v16 }
 0x583   : > { %v3846_v3 = vpop.f32.mrb[20].mxu1 }
 0x584   : > { %v2509_v7 = vpop.f32.mrb[21].mxu1 }
 0x587   : > { %v3853_v57 = vpop.f32.mrb[22].mxu0 }
 0x588   : > { %v2671_v58 = vsub.f32 %v3846_v3, %v3853_v57  ;;  %v2584_v59 = vpop.f32.mrb[23].mxu0 }
 0x589   : > { %v2670_v11 = vsub.f32 %v2509_v7, %v2584_v59  ;;  %v3860_v60 = vpop.f32.mrb[22].mxu1 }
 0x58a   : > { %v2673_v63 = vsub.f32 %v3860_v60, %v3846_v3  ;;  %v2661_v0 = vpop.f32.mrb[23].mxu1  ;;  %v2685_v8 = vmul.f32 %v3536_v61, %v2671_v58  ;;  %v2699_v9 = vmul.f32 %v3538_v62, %v2671_v58  ;;  %v3559_v58 = vld [vmem:[%s4944_s1 + $0x40] sm:$0xff] }
 0x58b   : > { %v2672_v2 = vsub.f32 %v2661_v0, %v2509_v7  ;;  %v3867_v15 = vpop.f32.mrb[24].mxu0  ;;  %v2684_v12 = vmul.f32 %v3535_v1, %v2670_v11  ;;  %v2698_v19 = vmul.f32 %v3537_v4, %v2670_v11  ;;  %v3562_v7 = vld [vmem:[%s4946_s12 + $0x48] sm:$0xff] }
 0x58c   : > { %v2675_v5 = vsub.f32 %v2673_v63, %v3853_v57  ;;  %v2784_v6 = vpop.f32.mrb[25].mxu0 }
 0x58d   : > { %v2674_v16 = vsub.f32 %v2672_v2, %v2584_v59  ;;  %v3874_v10 = vpop.f32.mrb[24].mxu1 }
 0x58e   : > { %v2687_v13 = vmul.f32 %v3538_v62, %v2675_v5  ;;  %v2697_v14 = vmul.f32 %v3536_v61, %v2675_v5  ;;  %v2958_v17 = vsub.f32 %v3867_v15, %v3874_v10  ;;  %v2865_v18 = vpop.f32.mrb[25].mxu1 }
 0x58f   : > { %v2686_v20 = vmul.f32 %v3537_v4, %v2674_v16  ;;  %v2696_v21 = vmul.f32 %v3535_v1, %v2674_v16  ;;  %v2957_v22 = vsub.f32 %v2784_v6, %v2865_v18  ;;  %v3881_v23 = vpop.f32.mrb[26].mxu0 }
 0x590   : > { %v2689_v24 = vadd.f32 %v2687_v13, %v2685_v8  ;;  %v2701_v25 = vsub.f32 %v2697_v14, %v2699_v9  ;;  %v2960_v26 = vsub.f32 %v3881_v23, %v3867_v15  ;;  %v2948_v27 = vpop.f32.mrb[27].mxu0 }
 0x591   : > { %v2688_v31 = vadd.f32 %v2686_v20, %v2684_v12  ;;  %v2700_v33 = vsub.f32 %v2696_v21, %v2698_v19  ;;  %v4011_v34 = vpack.c.bf16 %v2958_v17, %v2957_v22  ;;  %v2959_v35 = vsub.f32 %v2948_v27, %v2784_v6 }
 0x592   : > { %v2691_v37 = vadd.f32 %v2689_v24, %v2683_v28  ;;  %v2703_v38 = vadd.f32 %v3540_v29, %v2701_v25  ;;  %v2962_v42 = vsub.f32 %v2960_v26, %v3874_v10 }
 0x593   : > { %v2690_v43 = vadd.f32 %v2688_v31, %v2682_v40  ;;  %v2702_v44 = vadd.f32 %v3539_v41, %v2700_v33  ;;  %v2961_v45 = vsub.f32 %v2959_v35, %v2865_v18  ;;  %4012 = vmatprep.subr.bf16.mxu1 %v4011_v34 }
 0x594   : > { %2693 = vst.msk [vmem:[%s5043_s5 + $0x8] sm:$0xff] %vm593_vm0, %v2691_v37  ;;  %3542 = vst.msk [vmem:[%s5043_s5 + $0x18] sm:$0xff] %vm593_vm0, %v2703_v38  ;;  %v3114_v46 = vadd.f32 %v2962_v42, %v2958_v17  ;;  %4014 = vmatpush3.bf16.msra.mxu1 %v4011_v34 }
 0x595   : > { %2692 = vst.msk [vmem:[%s5043_s5] sm:$0xff] %vm593_vm0, %v2690_v43  ;;  %3541 = vst.msk [vmem:[%s5043_s5 + $0x10] sm:$0xff] %vm593_vm0, %v2702_v44  ;;  %v3113_v47 = vadd.f32 %v2961_v45, %v2957_v22  ;;  %v4015_v48 = vpack.c.bf16 %v2962_v42, %v2961_v45 }
 0x597   : > { %4016 = vmatprep.subr.bf16.mxu0 %v4015_v48  ;;  %3887 = vmatmul.mubr.msk.f32.vlgmr.msra.gmra.mrb[26].mxu1 %vm593_vm0, %v5003_v30  ;;  %v4019_v49 = vpack.c.bf16 %v3114_v46, %v3113_v47 }
 0x598   : > { %4018 = vmatpush3.bf16.msra.mxu0 %v4015_v48  ;;  %3900 = vmatprep.mubr.msk.f32.mxu1 %vm593_vm0, %v5005_v32  ;;  %v3560_v32 = vld [vmem:[%s4944_s1 + $0x48] sm:$0xff]  ;;  %s5367_s1 = smov %s5366_s16 }
 0x599   : > { %4020 = vmatprep.subr.bf16.mxu1 %v4019_v49 }
 0x59a   : > { %4022 = vmatpush3.bf16.msra.mxu1 %v4019_v49 }
 0x59b   : > { %3894 = vmatmul.mubr.msk.f32.vlgmr.msra.gmra.mrb[28].mxu0 %vm593_vm0, %v5014_v36  ;;  %v3561_v36 = vld [vmem:[%s4946_s12 + $0x40] sm:$0xff]  ;;  %v3203_v5 = vld [vmem:[%s5043_s5 + $0x8] sm:$0xff]  ;;  %v3564_v6 = vld [vmem:[%s5043_s5 + $0x18] sm:$0xff]  ;;  %s3227_s12 = scalar_lea.sflag [#allocation4], %s4927_s22 }
 0x59c   : > { %v3202_v12 = vld [vmem:[%s5043_s5] sm:$0xff]  ;;  %v3563_v13 = vld [vmem:[%s5043_s5 + $0x10] sm:$0xff] }
 0x59d   : > { %3901 = vmatmul.mubr.msk.f32.vlgmr.msra.gmra.mrb[28].mxu1 %vm593_vm0, %v5019_v39 }
 0x66a   : > { %v3888_v50 = vpop.f32.mrb[26].mxu1 }
 0x66b   : > { %v3029_v51 = vpop.f32.mrb[27].mxu1 }
 0x66e   : > { %v3895_v30 = vpop.f32.mrb[28].mxu0 }
 0x66f   : > { %v3191_v52 = vsub.f32 %v3888_v50, %v3895_v30  ;;  %v3104_v53 = vpop.f32.mrb[29].mxu0 }
 0x670   : > { %v3190_v54 = vsub.f32 %v3029_v51, %v3104_v53  ;;  %v3902_v55 = vpop.f32.mrb[28].mxu1 }
 0x671   : > { %v3193_v56 = vsub.f32 %v3902_v55, %v3888_v50  ;;  %v3181_v3 = vpop.f32.mrb[29].mxu1  ;;  %v3205_v11 = vmul.f32 %v3560_v32, %v3191_v52  ;;  %v3219_v60 = vmul.f32 %v3562_v7, %v3191_v52 }
 0x672   : > { %v3192_v57 = vsub.f32 %v3181_v3, %v3029_v51  ;;  %v3204_v63 = vmul.f32 %v3559_v58, %v3190_v54  ;;  %v3218_v0 = vmul.f32 %v3561_v36, %v3190_v54 }
 0x673   : > { %v3195_v59 = vsub.f32 %v3193_v56, %v3895_v30 }
 0x674   : > { %v3194_v39 = vsub.f32 %v3192_v57, %v3104_v53 }
 0x675   : > { %v3207_v61 = vmul.f32 %v3562_v7, %v3195_v59  ;;  %v3217_v62 = vmul.f32 %v3560_v32, %v3195_v59 }
 0x676   : > { %v3206_v1 = vmul.f32 %v3561_v36, %v3194_v39  ;;  %v3216_v2 = vmul.f32 %v3559_v58, %v3194_v39 }
 0x677   : > { %v3209_v15 = vadd.f32 %v3207_v61, %v3205_v11  ;;  %v3221_v4 = vsub.f32 %v3217_v62, %v3219_v60 }
 0x678   : > { %v3208_v8 = vadd.f32 %v3206_v1, %v3204_v63  ;;  %v3220_v9 = vsub.f32 %v3216_v2, %v3218_v0 }
 0x679   : > { %v3211_v16 = vadd.f32 %v3209_v15, %v3203_v5  ;;  %v3223_v10 = vadd.f32 %v3564_v6, %v3221_v4 }
 0x67a   : > { %v3210_v14 = vadd.f32 %v3208_v8, %v3202_v12  ;;  %v3222_v17 = vadd.f32 %v3563_v13, %v3220_v9 }
 0x67b   : > { %3213 = vst.msk [vmem:[%s5043_s5 + $0x8] sm:$0xff] %vm593_vm0, %v3211_v16  ;;  %3566 = vst.msk [vmem:[%s5043_s5 + $0x18] sm:$0xff] %vm593_vm0, %v3223_v10 }
 0x67c   : > { %3212 = vst.msk [vmem:[%s5043_s5] sm:$0xff] %vm593_vm0, %v3210_v14  ;;  %3565 = vst.msk [vmem:[%s5043_s5 + $0x10] sm:$0xff] %vm593_vm0, %v3222_v17 }
 0x67d   : > { %4400 = shalt.err (!%p4397_p8)
}
 0x67e   : > { %s4401_s28 = scalar_lea.hbm %s5222_s26, 512  ;;  %s4405_s19 = scalar_lea.hbm %s5367_s1, 1024 }
 0x67f   : > { %p4402_p1 = scmp.ne.s32.totalorder %s5222_s26, %s4401_s28  ;;  %p4406_p3 = scmp.lt.u32.totalorder %s5222_s26, %s5367_s1 }
 0x680   : > { %p4407_p7 = scmp.lt.u32.totalorder %s4405_s19, %s4401_s28  ;;  %p4409_p11 = scmp.lt.u32.totalorder %s4401_s28, %s5222_s26 }
 0x681   : > { %p4403_p10 = pnand %p4402_p1, %p5368_p4 }
 0x682   : > { %p4408_p5 = por %p4407_p7, %p4406_p3 }
 0x683   : > { %p4404_p6 = pneg %p4403_p10 }
 0x684   : > { %p4410_p9 = por %p4409_p11, %p4408_p5 }
 0x686   : > { %p4411_p2 = pnand %p4410_p9, %p4404_p6 }
 0x688   : > { %4414 = shalt.err (!%p4411_p2)
}
 0x689   : > { %s4503_s10 = smov 128   ;;  %s4504_s6 = smov 8  }
 0x68a   : > { %4056 = dma.vmem_to_hbm [thread:$0]  (%p5368_p4), %s5224_s13, 512, %s5222_s26, %s3227_s12, %s4503_s10, %s4503_s10, %s4504_s6  }
 0x68b PF: > { %s5369_s4 = sld [smem:[#allocation24_spill]]  ;;  %s5370_s24 = sld [smem:[#allocation29_spill]] }
 0x68c   : > { %p5372_p13 = scmp.ge.s32.totalorder %s4489_s18, 2 }
 0x691   : > { %s3255_s16 = sand.u32 1, %s5369_s4   ;;  %p5371_p12 = scmp.ne.s32.totalorder %s5370_s24, 0 }
 0x692   : > { %s3256_s21 = scalar_lea.sflag [#allocation4], %s3255_s16 }
 0x693   : > { %p4085_p0 = pnand %p5372_p13, %p5371_p12 }
 0x695   : > { %4464 = dma.done.wait (!%p4085_p0), %s3256_s21, 512  }
 0x696   : > { %4466 = vsyncadd (!%p4085_p0), %s3256_s21, 4294966784  ;;  %s34_s18 = sadd.s32 1, %s4489_s18   ;;  %s5373_s30 = sld [smem:[#allocation31_spill]] }
 0x697   : > { %p31_p8 = scmp.ge.s32.totalorder %s34_s18, 4   ;;  %s5374_s16 = sld [smem:[#allocation26_spill]] }
 0x698   : > { %s5375_s17 = sld [smem:[#allocation30_spill]]  ;;  %s5376_s13 = smov %s4473_s14 }
 0x699   : > { %s5377_s14 = smov %s4477_s15  ;;  %33 = sbr.rel (!%p31_p8) target bundleno = 19 (0x13), region = 179 }
 0x69c   : > { %s5378_s15 = smov %s5373_s30 }
 0x6a0   :  { %3261 = vsyncpa [#allocation3], 1 }
 0x6a1   :  { %3263 = vsyncpa [#allocation3 + $0x1], 1 }
 0x6a2   :  { %3264 = vsyncpa [#allocation6], 1 }
 0x6a3   :  { %3266 = vsyncpa [#allocation6 + $0x1], 1 }
 0x6a4   :  { %3267 = vsyncpa [#allocation9], 1 }
 0x6a5   :  { %3269 = vsyncpa [#allocation9 + $0x1], 1 }
 0x6a6   :  { %3270 = vsyncpa [#allocation12], 1 }
 0x6a7   :  { %3271 = vsyncpa [#allocation15], 1 }
 0x6a8   :  { %3272 = vsyncpa [#allocation4], 1 }
 0x6a9   :  { %3274 = vsyncpa [#allocation4 + $0x1], 1 }

</bundles_post_ra>
